<compile_context>
chip_gen: v5e
topology: v5e:2x2
jax: 0.10.0
libtpu: 0.0.40
codegen_flags: <defaults>
</compile_context>

<pallas_src>
import functools

import jax
import jax.numpy as jnp
import numpy as np
from jax import lax
from jax.experimental import pallas as pl
from jax.experimental.pallas import tpu as pltpu


# ----------------------------------------------------------------------------
# Small helpers
# ----------------------------------------------------------------------------
def _cdiv(a, b):
    return -(-a // b)


def _round_up(n, m):
    return _cdiv(n, m) * m


def _pad_to(x, shape):
    pads = [(0, s - d) for d, s in zip(x.shape, shape)]
    if all(p == (0, 0) for p in pads):
        return x
    return jnp.pad(x, pads)


_VMEM_CACHE = {}


def _vmem_limits():
    """Returns (vmem_limit_bytes, data_budget_bytes) derived from the chip."""
    if "v" not in _VMEM_CACHE:
        cap = 64 * 1024 * 1024                      # conservative default (v7x)
        try:
            cap = int(pltpu.get_tpu_info().vmem_capacity_bytes)
        except Exception:
            pass
        # leave headroom for Mosaic-internal scratch; never ask for > 96 MiB.
        limit = min(max(cap - 16 * 1024 * 1024, 32 * 1024 * 1024), 96 * 1024 * 1024)
        budget = int(limit * 0.7)                   # share used for data blocks
        _VMEM_CACHE["v"] = (limit, budget)
    return _VMEM_CACHE["v"]


# ----------------------------------------------------------------------------
# Glue ops (plain JAX): FPS, ball query, channels-first gather
# TODO(synk): farthest_point_sample is an inherently sequential data-dependent
# argmax loop and ball-query/gather are irregular indexing; they stay in plain
# JAX (no clean static-BlockSpec Pallas equivalent).
# ----------------------------------------------------------------------------
def farthest_point_sample(xyz, npoint):
    """xyz: [B, N, 3] -> centroid indices [B, npoint] (deterministic start=0)."""
    B, N, _ = xyz.shape
    batch = jnp.arange(B)

    def body(i, state):
        distance, farthest, centroids = state
        centroids = centroids.at[:, i].set(farthest)
        centroid = xyz[batch, farthest][:, None, :]              # [B,1,3]
        dist = jnp.sum((xyz - centroid) ** 2, axis=-1)           # [B,N]
        distance = jnp.minimum(distance, dist)
        farthest = jnp.argmax(distance, axis=-1).astype(jnp.int32)
        return distance, farthest, centroids

    init = (jnp.full((B, N), 1e10, jnp.float32),
            jnp.zeros((B,), jnp.int32),
            jnp.zeros((B, npoint), jnp.int32))
    _, _, centroids = lax.fori_loop(0, npoint, body, init)
    return centroids


def index_points(points, idx):
    """points: [B, N, C]; idx: [B, ...] -> [B, ..., C]."""
    B = points.shape[0]
    batch = jnp.arange(B).reshape((B,) + (1,) * (idx.ndim - 1))
    return points[batch, idx]


def square_distance(src, dst):
    """src: [B, N, C]; dst: [B, M, C] -> [B, N, M] squared distances."""
    dist = -2.0 * jnp.einsum('bnc,bmc->bnm', src, dst)
    dist = dist + jnp.sum(src ** 2, axis=-1)[:, :, None]
    dist = dist + jnp.sum(dst ** 2, axis=-1)[:, None, :]
    return dist


def query_ball_point(radius, nsample, xyz, new_xyz):
    """xyz: [B, N, 3]; new_xyz: [B, S, 3] -> group indices [B, S, nsample]."""
    B, N, _ = xyz.shape
    S = new_xyz.shape[1]
    sqrdists = square_distance(new_xyz, xyz)                     # [B,S,N]
    idx = jnp.broadcast_to(jnp.arange(N, dtype=jnp.int32), (B, S, N))
    idx = jnp.where(sqrdists > radius ** 2, N, idx)
    # nsample smallest indices == top_k of negated values (avoids a full sort
    # over N, which dominated wall clock at realistic N).
    neg_topk, _ = lax.top_k(-idx, nsample)
    group_idx = -neg_topk                                        # ascending
    group_first = group_idx[:, :, :1]
    group_idx = jnp.where(group_idx == N, group_first, group_idx)
    return group_idx


# ----------------------------------------------------------------------------
# Pallas kernel: per-point MLP (1x1 conv + folded BN + ReLU) with the
# K-neighbor max folded into the per-k loop.
# ----------------------------------------------------------------------------
def _make_msg_mlp_max_kernel(n_layers, K):
    def kernel(x_ref, *refs):
        w_refs = refs[:n_layers]
        b_refs = refs[n_layers:2 * n_layers]
        out_ref = refs[2 * n_layers]

        for k in range(K):                       # static unroll over neighbors
            h = x_ref[k]                         # (Cin_pad, TG) bf16, free view
            acc = None
            for j in range(n_layers):
                acc = jnp.dot(w_refs[j][...], h,
                              preferred_element_type=jnp.float32)   # MXU
                acc = jnp.maximum(acc + b_refs[j][...], 0.0)        # f32 VPU
                if j + 1 < n_layers:
                    h = acc.astype(jnp.bfloat16)                    # bf16 -> MXU
            # running max accumulates straight into the VMEM output block;
            # only one (Cout_pad, TG) f32 intermediate is ever live.
            if k == 0:
                out_ref[...] = acc
            else:
                out_ref[...] = jnp.maximum(out_ref[...], acc)
    return kernel


def msg_mlp_max(slab_kcg, Ws, bs):
    """slab_kcg: [K, Cin, G] f32; Ws[j]: [Cout_j, Cin_j]; bs[j]: [Cout_j, 1]
       -> pooled features, channels-first [Cout_last, G] f32."""
    K, Cin, G = slab_kcg.shape
    n_layers = len(Ws)

    cins = [Cin] + [w.shape[0] for w in Ws[:-1]]
    couts = [w.shape[0] for w in Ws]
    # bf16 native vreg tile is (16, 128): round channel pads to 16 so neither
    # the slab nor the inter-layer bf16 activations need masked/packed layouts.
    cin_pads = [_round_up(c, 16) for c in cins]
    cout_pads = [_round_up(c, 16) for c in couts]

    Wp = [_pad_to(w, (cout_pads[j], cin_pads[j])).astype(jnp.bfloat16)
          for j, w in enumerate(Ws)]
    bp = [_pad_to(b, (cout_pads[j], 1)).astype(jnp.float32)
          for j, b in enumerate(bs)]

    # ---- tile sizing against an explicit per-generation VMEM budget --------
    vmem_limit, budget = _vmem_limits()
    max_c = max(cin_pads + cout_pads)
    per_col = (4 * K * cin_pads[0]        # bf16 input block, double-buffered
               + 8 * cout_pads[-1]        # f32 output block, double-buffered
               + 2 * max_c                # live bf16 activation h
               + 4 * max(cout_pads)       # live f32 acc
               + 4 * max_c)               # slack for compiler temporaries
    TG = (budget // per_col) // 128 * 128
    TG = max(128, min(TG, 16384))
    G128 = _round_up(G, 128)
    if G128 >= 256:
        # keep >= 2 grid steps so the "parallel" axis can shard over 2 TCs (v7x)
        TG = min(TG, _round_up(_cdiv(G128, 2), 128))
    else:
        TG = min(TG, G128)
    G_pad = _round_up(G, TG)
    ntiles = G_pad // TG

    x = _pad_to(slab_kcg, (K, cin_pads[0], G_pad)).astype(jnp.bfloat16)

    in_specs = [pl.BlockSpec((K, cin_pads[0], TG), lambda g: (0, 0, g))]
    # Constant index_maps -> weights/biases stay VMEM-resident across steps.
    in_specs += [pl.BlockSpec(w.shape, lambda g: (0, 0)) for w in Wp]
    in_specs += [pl.BlockSpec(b.shape, lambda g: (0, 0)) for b in bp]

    out = pl.pallas_call(
        _make_msg_mlp_max_kernel(n_layers, K),
        out_shape=jax.ShapeDtypeStruct((cout_pads[-1], G_pad), jnp.float32),
        grid=(ntiles,),
        in_specs=in_specs,
        out_specs=pl.BlockSpec((cout_pads[-1], TG), lambda g: (0, g)),
        compiler_params=pltpu.CompilerParams(
            dimension_semantics=("parallel",),
            vmem_limit_bytes=vmem_limit),
    )(x, *Wp, *bp)

    return out[:couts[-1], :G]                   # strip channel/group padding


def _ref_mlp_max(slab_kcg, Ws, bs):
    """Pure-JAX f32 reference: [K, Cin, G] -> [G, Cout_last]."""
    h = jnp.transpose(slab_kcg, (2, 0, 1))       # [G, K, Cin]
    for W, b in zip(Ws, bs):
        h = jnp.maximum(jnp.einsum('gkc,oc->gko', h, W) + b[:, 0], 0.0)
    return jnp.max(h, axis=1)


# ----------------------------------------------------------------------------
# Parameter construction (deterministic), BatchNorm folded (eval mode)
# ----------------------------------------------------------------------------
def make_params(key, in_channel, mlp_list, eps=1e-5):
    params = []
    for mlp in mlp_list:
        Ws, bs = [], []
        last = in_channel + 3
        for out_c in mlp:
            key, k1, k2, k3, k4, k5, k6 = jax.random.split(key, 7)
            Wc = jax.random.normal(k1, (out_c, last), jnp.float32) * 0.1
            bc = jax.random.normal(k2, (out_c,), jnp.float32) * 0.1
            gamma = 1.0 + 0.1 * jax.random.normal(k3, (out_c,), jnp.float32)
            beta = 0.1 * jax.random.normal(k4, (out_c,), jnp.float32)
            mean = 0.1 * jax.random.normal(k5, (out_c,), jnp.float32)
            var = jnp.abs(jax.random.normal(k6, (out_c,), jnp.float32)) + 0.5
            scale = gamma / jnp.sqrt(var + eps)
            W_eff = Wc * scale[:, None]                          # (out, in)
            b_eff = ((bc - mean) * scale + beta).reshape(out_c, 1)
            Ws.append(W_eff)
            bs.append(b_eff)
            last = out_c
        params.append({'W': Ws, 'b': bs})
    # TODO(synk): self.mlp (time-embedding head) is never used in forward(); skipped.
    return params


# ----------------------------------------------------------------------------
# Full forward pass of PointNetSetAbstractionMsg
# ----------------------------------------------------------------------------
def _sample_and_group_cf(xyz_bcn, points_bdn, npoint, radius_list, nsample_list):
    """Channels-first gather straight from [B,C,N] inputs.
       Returns new_xyz_cf [B,3,S] and a list of slabs [K_i, Cin, B*S] f32."""
    xyz = jnp.transpose(xyz_bcn, (0, 2, 1))                      # [B,N,3]
    B, N, _ = xyz.shape
    S = npoint

    fps_idx = farthest_point_sample(xyz, S)
    new_xyz = index_points(xyz, fps_idx)                         # [B,S,3]
    new_xyz_cf = jnp.transpose(new_xyz, (0, 2, 1))               # [B,3,S]

    slabs = []
    for i, radius in enumerate(radius_list):
        K = nsample_list[i]
        gidx = query_ball_point(radius, K, xyz, new_xyz)         # [B,S,K]
        idx_flat = gidx.reshape(B, 1, S * K)

        gx = jnp.take_along_axis(
            xyz_bcn, jnp.broadcast_to(idx_flat, (B, 3, S * K)), axis=2)
        gx = gx.reshape(B, 3, S, K) - new_xyz_cf[:, :, :, None]  # relative xyz

        if points_bdn is not None:
            D = points_bdn.shape[1]
            gp = jnp.take_along_axis(
                points_bdn, jnp.broadcast_to(idx_flat, (B, D, S * K)), axis=2)
            gp = gp.reshape(B, D, S, K)
            grouped = jnp.concatenate([gp, gx], axis=1)          # [B,Cin,S,K]
        else:
            grouped = gx

        Cin = grouped.shape[1]
        slab = jnp.transpose(grouped, (3, 1, 0, 2)).reshape(K, Cin, B * S)
        slabs.append(slab)
    return new_xyz_cf, slabs


def set_abstraction_msg_forward(xyz_bcn, points_bdn, params, *,
                                npoint, radius_list, nsample_list):
    """xyz_bcn: [B, 3, N], points_bdn: [B, D, N] ->
       (new_xyz [B, 3, S], new_points_concat [B, sum(Cout_i), S])."""
    B = xyz_bcn.shape[0]
    S = npoint
    new_xyz_cf, slabs = _sample_and_group_cf(
        xyz_bcn, points_bdn, npoint, radius_list, nsample_list)

    pooled_list = []
    for i, slab in enumerate(slabs):
        pooled = msg_mlp_max(slab, params[i]['W'], params[i]['b'])   # [Cout_i, B*S]
        pooled_list.append(pooled.reshape(-1, B, S))                 # [Cout_i, B, S]

    new_points_concat = jnp.transpose(
        jnp.concatenate(pooled_list, axis=0), (1, 0, 2))             # [B, sumC, S]
    return new_xyz_cf, new_points_concat


# ----------------------------------------------------------------------------
if __name__ == "__main__":
    key = jax.random.PRNGKey(0)

    # Module config (small, consistent with __init__ signature)
    B, N = 2, 32
    in_channel = 4                     # D feature channels
    npoint = 8                         # S
    radius_list = (0.4, 0.8)
    nsample_list = (8, 16)
    mlp_list = [[8, 16], [8, 16]]      # -> concat channels = 32

    k_xyz, k_pts, k_par = jax.random.split(key, 3)
    xyz = jax.random.uniform(k_xyz, (B, 3, N), jnp.float32)             # [B, 3, N]
    points = jax.random.normal(k_pts, (B, in_channel, N), jnp.float32)  # [B, D, N]

    params = make_params(k_par, in_channel, mlp_list)

    forward = jax.jit(functools.partial(
        set_abstraction_msg_forward,
        npoint=npoint, radius_list=radius_list, nsample_list=nsample_list))

    new_xyz, new_points = forward(xyz, points, params)
    new_xyz = jax.block_until_ready(new_xyz)
    new_points = jax.block_until_ready(new_points)

    assert new_xyz.shape == (B, 3, npoint)
    assert new_points.shape == (B, sum(m[-1] for m in mlp_list), npoint)
    assert np.all(np.isfinite(np.asarray(new_xyz)))
    assert np.all(np.isfinite(np.asarray(new_points)))

    # One-time kernel correctness check against a pure-JAX f32 reference on the
    # SAME grouped slabs (kept out of the forward path; loose tolerance covers
    # the bf16 MXU inputs).
    _, slabs = _sample_and_group_cf(xyz, points, npoint, radius_list, nsample_list)
    for i, slab in enumerate(slabs):
        got = msg_mlp_max(slab, params[i]['W'], params[i]['b'])          # [Cout, G]
        want = jnp.transpose(_ref_mlp_max(slab, params[i]['W'], params[i]['b']))
        np.testing.assert_allclose(np.asarray(got), np.asarray(want),
                                   rtol=5e-2, atol=5e-2)

    print("KERNEL_OK")
</pallas_src>

<mosaic_0001>
module attributes {stable_mosaic.version = 11 : i64} {
  func.func @kernel(%arg0: i32, %arg1: memref<8x16x128xbf16, #tpu.memory_space<vmem>>, %arg2: memref<16x16xbf16, #tpu.memory_space<vmem>>, %arg3: memref<16x16xbf16, #tpu.memory_space<vmem>>, %arg4: memref<16x1xf32, #tpu.memory_space<vmem>>, %arg5: memref<16x1xf32, #tpu.memory_space<vmem>>, %arg6: memref<16x128xf32, #tpu.memory_space<vmem>>) attributes {dimension_semantics = [#tpu.dimension_semantics<parallel>], iteration_bounds = array<i64: 1>, scalar_prefetch = 0 : i64, scratch_operands = 0 : i64, tpu.core_type = #tpu.core_type<tc>, window_params = [{transform_indices = @transform_0, window_bounds = array<i64: 8, 16, 128>}, {pipeline_mode = #tpu.pipeline_mode<synchronous>, transform_indices = @transform_1, window_bounds = array<i64: 16, 16>}, {pipeline_mode = #tpu.pipeline_mode<synchronous>, transform_indices = @transform_2, window_bounds = array<i64: 16, 16>}, {pipeline_mode = #tpu.pipeline_mode<synchronous>, transform_indices = @transform_3, window_bounds = array<i64: 16, 1>}, {pipeline_mode = #tpu.pipeline_mode<synchronous>, transform_indices = @transform_4, window_bounds = array<i64: 16, 1>}, {transform_indices = @transform_5, window_bounds = array<i64: 16, 128>}]} {
    %c0 = arith.constant 0 : index
    %c0_0 = arith.constant 0 : index
    %c0_1 = arith.constant 0 : index
    %0 = vector.load %arg1[%c0, %c0_0, %c0_1] : memref<8x16x128xbf16, #tpu.memory_space<vmem>>, vector<1x16x128xbf16>
    %1 = vector.shape_cast %0 : vector<1x16x128xbf16> to vector<16x128xbf16>
    %c0_2 = arith.constant 0 : index
    %c0_3 = arith.constant 0 : index
    %2 = vector.load %arg2[%c0_2, %c0_3] : memref<16x16xbf16, #tpu.memory_space<vmem>>, vector<16x16xbf16>
    %cst = arith.constant dense<0.000000e+00> : vector<16x128xf32>
    %3 = tpu.matmul %2, %1, %cst {dimension_numbers = #tpu.dot_dimension_numbers<[1], [0], [0], [1], [0, 0, 1, 1], [], []>} : vector<16x16xbf16>, vector<16x128xbf16>, vector<16x128xf32> -> vector<16x128xf32>
    %c0_4 = arith.constant 0 : index
    %c0_5 = arith.constant 0 : index
    %4 = vector.load %arg4[%c0_4, %c0_5] : memref<16x1xf32, #tpu.memory_space<vmem>>, vector<16x1xf32>
    %5 = vector.broadcast %4 : vector<16x1xf32> to vector<16x128xf32>
    %6 = arith.addf %3, %5 : vector<16x128xf32>
    %cst_6 = arith.constant 0.000000e+00 : f32
    %7 = vector.broadcast %cst_6 : f32 to vector<16x128xf32>
    %8 = arith.maximumf %6, %7 : vector<16x128xf32>
    %9 = arith.truncf %8 : vector<16x128xf32> to vector<16x128xbf16>
    %c0_7 = arith.constant 0 : index
    %c0_8 = arith.constant 0 : index
    %10 = vector.load %arg3[%c0_7, %c0_8] : memref<16x16xbf16, #tpu.memory_space<vmem>>, vector<16x16xbf16>
    %cst_9 = arith.constant dense<0.000000e+00> : vector<16x128xf32>
    %11 = tpu.matmul %10, %9, %cst_9 {dimension_numbers = #tpu.dot_dimension_numbers<[1], [0], [0], [1], [0, 0, 1, 1], [], []>} : vector<16x16xbf16>, vector<16x128xbf16>, vector<16x128xf32> -> vector<16x128xf32>
    %c0_10 = arith.constant 0 : index
    %c0_11 = arith.constant 0 : index
    %12 = vector.load %arg5[%c0_10, %c0_11] : memref<16x1xf32, #tpu.memory_space<vmem>>, vector<16x1xf32>
    %13 = vector.broadcast %12 : vector<16x1xf32> to vector<16x128xf32>
    %14 = arith.addf %11, %13 : vector<16x128xf32>
    %cst_12 = arith.constant 0.000000e+00 : f32
    %15 = vector.broadcast %cst_12 : f32 to vector<16x128xf32>
    %16 = arith.maximumf %14, %15 : vector<16x128xf32>
    %c0_13 = arith.constant 0 : index
    %c0_14 = arith.constant 0 : index
    %17 = vector.load %arg6[%c0_13, %c0_14] : memref<16x128xf32, #tpu.memory_space<vmem>>, vector<16x128xf32>
    tpu.vector_store %arg6[%c0_13, %c0_14], %16 {strides = array<i32>} : memref<16x128xf32, #tpu.memory_space<vmem>>, vector<16x128xf32>,
    %c1 = arith.constant 1 : index
    %c0_15 = arith.constant 0 : index
    %c0_16 = arith.constant 0 : index
    %18 = vector.load %arg1[%c1, %c0_15, %c0_16] : memref<8x16x128xbf16, #tpu.memory_space<vmem>>, vector<1x16x128xbf16>
    %19 = vector.shape_cast %18 : vector<1x16x128xbf16> to vector<16x128xbf16>
    %c0_17 = arith.constant 0 : index
    %c0_18 = arith.constant 0 : index
    %20 = vector.load %arg2[%c0_17, %c0_18] : memref<16x16xbf16, #tpu.memory_space<vmem>>, vector<16x16xbf16>
    %cst_19 = arith.constant dense<0.000000e+00> : vector<16x128xf32>
    %21 = tpu.matmul %20, %19, %cst_19 {dimension_numbers = #tpu.dot_dimension_numbers<[1], [0], [0], [1], [0, 0, 1, 1], [], []>} : vector<16x16xbf16>, vector<16x128xbf16>, vector<16x128xf32> -> vector<16x128xf32>
    %c0_20 = arith.constant 0 : index
    %c0_21 = arith.constant 0 : index
    %22 = vector.load %arg4[%c0_20, %c0_21] : memref<16x1xf32, #tpu.memory_space<vmem>>, vector<16x1xf32>
    %23 = vector.broadcast %22 : vector<16x1xf32> to vector<16x128xf32>
    %24 = arith.addf %21, %23 : vector<16x128xf32>
    %cst_22 = arith.constant 0.000000e+00 : f32
    %25 = vector.broadcast %cst_22 : f32 to vector<16x128xf32>
    %26 = arith.maximumf %24, %25 : vector<16x128xf32>
    %27 = arith.truncf %26 : vector<16x128xf32> to vector<16x128xbf16>
    %c0_23 = arith.constant 0 : index
    %c0_24 = arith.constant 0 : index
    %28 = vector.load %arg3[%c0_23, %c0_24] : memref<16x16xbf16, #tpu.memory_space<vmem>>, vector<16x16xbf16>
    %cst_25 = arith.constant dense<0.000000e+00> : vector<16x128xf32>
    %29 = tpu.matmul %28, %27, %cst_25 {dimension_numbers = #tpu.dot_dimension_numbers<[1], [0], [0], [1], [0, 0, 1, 1], [], []>} : vector<16x16xbf16>, vector<16x128xbf16>, vector<16x128xf32> -> vector<16x128xf32>
    %c0_26 = arith.constant 0 : index
    %c0_27 = arith.constant 0 : index
    %30 = vector.load %arg5[%c0_26, %c0_27] : memref<16x1xf32, #tpu.memory_space<vmem>>, vector<16x1xf32>
    %31 = vector.broadcast %30 : vector<16x1xf32> to vector<16x128xf32>
    %32 = arith.addf %29, %31 : vector<16x128xf32>
    %cst_28 = arith.constant 0.000000e+00 : f32
    %33 = vector.broadcast %cst_28 : f32 to vector<16x128xf32>
    %34 = arith.maximumf %32, %33 : vector<16x128xf32>
    %c0_29 = arith.constant 0 : index
    %c0_30 = arith.constant 0 : index
    %35 = vector.load %arg6[%c0_29, %c0_30] : memref<16x128xf32, #tpu.memory_space<vmem>>, vector<16x128xf32>
    %36 = arith.maximumf %35, %34 : vector<16x128xf32>
    %c0_31 = arith.constant 0 : index
    %c0_32 = arith.constant 0 : index
    %37 = vector.load %arg6[%c0_31, %c0_32] : memref<16x128xf32, #tpu.memory_space<vmem>>, vector<16x128xf32>
    tpu.vector_store %arg6[%c0_31, %c0_32], %36 {strides = array<i32>} : memref<16x128xf32, #tpu.memory_space<vmem>>, vector<16x128xf32>,
    %c2 = arith.constant 2 : index
    %c0_33 = arith.constant 0 : index
    %c0_34 = arith.constant 0 : index
    %38 = vector.load %arg1[%c2, %c0_33, %c0_34] : memref<8x16x128xbf16, #tpu.memory_space<vmem>>, vector<1x16x128xbf16>
    %39 = vector.shape_cast %38 : vector<1x16x128xbf16> to vector<16x128xbf16>
    %c0_35 = arith.constant 0 : index
    %c0_36 = arith.constant 0 : index
    %40 = vector.load %arg2[%c0_35, %c0_36] : memref<16x16xbf16, #tpu.memory_space<vmem>>, vector<16x16xbf16>
    %cst_37 = arith.constant dense<0.000000e+00> : vector<16x128xf32>
    %41 = tpu.matmul %40, %39, %cst_37 {dimension_numbers = #tpu.dot_dimension_numbers<[1], [0], [0], [1], [0, 0, 1, 1], [], []>} : vector<16x16xbf16>, vector<16x128xbf16>, vector<16x128xf32> -> vector<16x128xf32>
    %c0_38 = arith.constant 0 : index
    %c0_39 = arith.constant 0 : index
    %42 = vector.load %arg4[%c0_38, %c0_39] : memref<16x1xf32, #tpu.memory_space<vmem>>, vector<16x1xf32>
    %43 = vector.broadcast %42 : vector<16x1xf32> to vector<16x128xf32>
    %44 = arith.addf %41, %43 : vector<16x128xf32>
    %cst_40 = arith.constant 0.000000e+00 : f32
    %45 = vector.broadcast %cst_40 : f32 to vector<16x128xf32>
    %46 = arith.maximumf %44, %45 : vector<16x128xf32>
    %47 = arith.truncf %46 : vector<16x128xf32> to vector<16x128xbf16>
    %c0_41 = arith.constant 0 : index
    %c0_42 = arith.constant 0 : index
    %48 = vector.load %arg3[%c0_41, %c0_42] : memref<16x16xbf16, #tpu.memory_space<vmem>>, vector<16x16xbf16>
    %cst_43 = arith.constant dense<0.000000e+00> : vector<16x128xf32>
    %49 = tpu.matmul %48, %47, %cst_43 {dimension_numbers = #tpu.dot_dimension_numbers<[1], [0], [0], [1], [0, 0, 1, 1], [], []>} : vector<16x16xbf16>, vector<16x128xbf16>, vector<16x128xf32> -> vector<16x128xf32>
    %c0_44 = arith.constant 0 : index
    %c0_45 = arith.constant 0 : index
    %50 = vector.load %arg5[%c0_44, %c0_45] : memref<16x1xf32, #tpu.memory_space<vmem>>, vector<16x1xf32>
    %51 = vector.broadcast %50 : vector<16x1xf32> to vector<16x128xf32>
    %52 = arith.addf %49, %51 : vector<16x128xf32>
    %cst_46 = arith.constant 0.000000e+00 : f32
    %53 = vector.broadcast %cst_46 : f32 to vector<16x128xf32>
    %54 = arith.maximumf %52, %53 : vector<16x128xf32>
    %c0_47 = arith.constant 0 : index
    %c0_48 = arith.constant 0 : index
    %55 = vector.load %arg6[%c0_47, %c0_48] : memref<16x128xf32, #tpu.memory_space<vmem>>, vector<16x128xf32>
    %56 = arith.maximumf %55, %54 : vector<16x128xf32>
    %c0_49 = arith.constant 0 : index
    %c0_50 = arith.constant 0 : index
    %57 = vector.load %arg6[%c0_49, %c0_50] : memref<16x128xf32, #tpu.memory_space<vmem>>, vector<16x128xf32>
    tpu.vector_store %arg6[%c0_49, %c0_50], %56 {strides = array<i32>} : memref<16x128xf32, #tpu.memory_space<vmem>>, vector<16x128xf32>,
    %c3 = arith.constant 3 : index
    %c0_51 = arith.constant 0 : index
    %c0_52 = arith.constant 0 : index
    %58 = vector.load %arg1[%c3, %c0_51, %c0_52] : memref<8x16x128xbf16, #tpu.memory_space<vmem>>, vector<1x16x128xbf16>
    %59 = vector.shape_cast %58 : vector<1x16x128xbf16> to vector<16x128xbf16>
    %c0_53 = arith.constant 0 : index
    %c0_54 = arith.constant 0 : index
    %60 = vector.load %arg2[%c0_53, %c0_54] : memref<16x16xbf16, #tpu.memory_space<vmem>>, vector<16x16xbf16>
    %cst_55 = arith.constant dense<0.000000e+00> : vector<16x128xf32>
    %61 = tpu.matmul %60, %59, %cst_55 {dimension_numbers = #tpu.dot_dimension_numbers<[1], [0], [0], [1], [0, 0, 1, 1], [], []>} : vector<16x16xbf16>, vector<16x128xbf16>, vector<16x128xf32> -> vector<16x128xf32>
    %c0_56 = arith.constant 0 : index
    %c0_57 = arith.constant 0 : index
    %62 = vector.load %arg4[%c0_56, %c0_57] : memref<16x1xf32, #tpu.memory_space<vmem>>, vector<16x1xf32>
    %63 = vector.broadcast %62 : vector<16x1xf32> to vector<16x128xf32>
    %64 = arith.addf %61, %63 : vector<16x128xf32>
    %cst_58 = arith.constant 0.000000e+00 : f32
    %65 = vector.broadcast %cst_58 : f32 to vector<16x128xf32>
    %66 = arith.maximumf %64, %65 : vector<16x128xf32>
    %67 = arith.truncf %66 : vector<16x128xf32> to vector<16x128xbf16>
    %c0_59 = arith.constant 0 : index
    %c0_60 = arith.constant 0 : index
    %68 = vector.load %arg3[%c0_59, %c0_60] : memref<16x16xbf16, #tpu.memory_space<vmem>>, vector<16x16xbf16>
    %cst_61 = arith.constant dense<0.000000e+00> : vector<16x128xf32>
    %69 = tpu.matmul %68, %67, %cst_61 {dimension_numbers = #tpu.dot_dimension_numbers<[1], [0], [0], [1], [0, 0, 1, 1], [], []>} : vector<16x16xbf16>, vector<16x128xbf16>, vector<16x128xf32> -> vector<16x128xf32>
    %c0_62 = arith.constant 0 : index
    %c0_63 = arith.constant 0 : index
    %70 = vector.load %arg5[%c0_62, %c0_63] : memref<16x1xf32, #tpu.memory_space<vmem>>, vector<16x1xf32>
    %71 = vector.broadcast %70 : vector<16x1xf32> to vector<16x128xf32>
    %72 = arith.addf %69, %71 : vector<16x128xf32>
    %cst_64 = arith.constant 0.000000e+00 : f32
    %73 = vector.broadcast %cst_64 : f32 to vector<16x128xf32>
    %74 = arith.maximumf %72, %73 : vector<16x128xf32>
    %c0_65 = arith.constant 0 : index
    %c0_66 = arith.constant 0 : index
    %75 = vector.load %arg6[%c0_65, %c0_66] : memref<16x128xf32, #tpu.memory_space<vmem>>, vector<16x128xf32>
    %76 = arith.maximumf %75, %74 : vector<16x128xf32>
    %c0_67 = arith.constant 0 : index
    %c0_68 = arith.constant 0 : index
    %77 = vector.load %arg6[%c0_67, %c0_68] : memref<16x128xf32, #tpu.memory_space<vmem>>, vector<16x128xf32>
    tpu.vector_store %arg6[%c0_67, %c0_68], %76 {strides = array<i32>} : memref<16x128xf32, #tpu.memory_space<vmem>>, vector<16x128xf32>,
    %c4 = arith.constant 4 : index
    %c0_69 = arith.constant 0 : index
    %c0_70 = arith.constant 0 : index
    %78 = vector.load %arg1[%c4, %c0_69, %c0_70] : memref<8x16x128xbf16, #tpu.memory_space<vmem>>, vector<1x16x128xbf16>
    %79 = vector.shape_cast %78 : vector<1x16x128xbf16> to vector<16x128xbf16>
    %c0_71 = arith.constant 0 : index
    %c0_72 = arith.constant 0 : index
    %80 = vector.load %arg2[%c0_71, %c0_72] : memref<16x16xbf16, #tpu.memory_space<vmem>>, vector<16x16xbf16>
    %cst_73 = arith.constant dense<0.000000e+00> : vector<16x128xf32>
    %81 = tpu.matmul %80, %79, %cst_73 {dimension_numbers = #tpu.dot_dimension_numbers<[1], [0], [0], [1], [0, 0, 1, 1], [], []>} : vector<16x16xbf16>, vector<16x128xbf16>, vector<16x128xf32> -> vector<16x128xf32>
    %c0_74 = arith.constant 0 : index
    %c0_75 = arith.constant 0 : index
    %82 = vector.load %arg4[%c0_74, %c0_75] : memref<16x1xf32, #tpu.memory_space<vmem>>, vector<16x1xf32>
    %83 = vector.broadcast %82 : vector<16x1xf32> to vector<16x128xf32>
    %84 = arith.addf %81, %83 : vector<16x128xf32>
    %cst_76 = arith.constant 0.000000e+00 : f32
    %85 = vector.broadcast %cst_76 : f32 to vector<16x128xf32>
    %86 = arith.maximumf %84, %85 : vector<16x128xf32>
    %87 = arith.truncf %86 : vector<16x128xf32> to vector<16x128xbf16>
    %c0_77 = arith.constant 0 : index
    %c0_78 = arith.constant 0 : index
    %88 = vector.load %arg3[%c0_77, %c0_78] : memref<16x16xbf16, #tpu.memory_space<vmem>>, vector<16x16xbf16>
    %cst_79 = arith.constant dense<0.000000e+00> : vector<16x128xf32>
    %89 = tpu.matmul %88, %87, %cst_79 {dimension_numbers = #tpu.dot_dimension_numbers<[1], [0], [0], [1], [0, 0, 1, 1], [], []>} : vector<16x16xbf16>, vector<16x128xbf16>, vector<16x128xf32> -> vector<16x128xf32>
    %c0_80 = arith.constant 0 : index
    %c0_81 = arith.constant 0 : index
    %90 = vector.load %arg5[%c0_80, %c0_81] : memref<16x1xf32, #tpu.memory_space<vmem>>, vector<16x1xf32>
    %91 = vector.broadcast %90 : vector<16x1xf32> to vector<16x128xf32>
    %92 = arith.addf %89, %91 : vector<16x128xf32>
    %cst_82 = arith.constant 0.000000e+00 : f32
    %93 = vector.broadcast %cst_82 : f32 to vector<16x128xf32>
    %94 = arith.maximumf %92, %93 : vector<16x128xf32>
    %c0_83 = arith.constant 0 : index
    %c0_84 = arith.constant 0 : index
    %95 = vector.load %arg6[%c0_83, %c0_84] : memref<16x128xf32, #tpu.memory_space<vmem>>, vector<16x128xf32>
    %96 = arith.maximumf %95, %94 : vector<16x128xf32>
    %c0_85 = arith.constant 0 : index
    %c0_86 = arith.constant 0 : index
    %97 = vector.load %arg6[%c0_85, %c0_86] : memref<16x128xf32, #tpu.memory_space<vmem>>, vector<16x128xf32>
    tpu.vector_store %arg6[%c0_85, %c0_86], %96 {strides = array<i32>} : memref<16x128xf32, #tpu.memory_space<vmem>>, vector<16x128xf32>,
    %c5 = arith.constant 5 : index
    %c0_87 = arith.constant 0 : index
    %c0_88 = arith.constant 0 : index
    %98 = vector.load %arg1[%c5, %c0_87, %c0_88] : memref<8x16x128xbf16, #tpu.memory_space<vmem>>, vector<1x16x128xbf16>
    %99 = vector.shape_cast %98 : vector<1x16x128xbf16> to vector<16x128xbf16>
    %c0_89 = arith.constant 0 : index
    %c0_90 = arith.constant 0 : index
    %100 = vector.load %arg2[%c0_89, %c0_90] : memref<16x16xbf16, #tpu.memory_space<vmem>>, vector<16x16xbf16>
    %cst_91 = arith.constant dense<0.000000e+00> : vector<16x128xf32>
    %101 = tpu.matmul %100, %99, %cst_91 {dimension_numbers = #tpu.dot_dimension_numbers<[1], [0], [0], [1], [0, 0, 1, 1], [], []>} : vector<16x16xbf16>, vector<16x128xbf16>, vector<16x128xf32> -> vector<16x128xf32>
    %c0_92 = arith.constant 0 : index
    %c0_93 = arith.constant 0 : index
    %102 = vector.load %arg4[%c0_92, %c0_93] : memref<16x1xf32, #tpu.memory_space<vmem>>, vector<16x1xf32>
    %103 = vector.broadcast %102 : vector<16x1xf32> to vector<16x128xf32>
    %104 = arith.addf %101, %103 : vector<16x128xf32>
    %cst_94 = arith.constant 0.000000e+00 : f32
    %105 = vector.broadcast %cst_94 : f32 to vector<16x128xf32>
    %106 = arith.maximumf %104, %105 : vector<16x128xf32>
    %107 = arith.truncf %106 : vector<16x128xf32> to vector<16x128xbf16>
    %c0_95 = arith.constant 0 : index
    %c0_96 = arith.constant 0 : index
    %108 = vector.load %arg3[%c0_95, %c0_96] : memref<16x16xbf16, #tpu.memory_space<vmem>>, vector<16x16xbf16>
    %cst_97 = arith.constant dense<0.000000e+00> : vector<16x128xf32>
    %109 = tpu.matmul %108, %107, %cst_97 {dimension_numbers = #tpu.dot_dimension_numbers<[1], [0], [0], [1], [0, 0, 1, 1], [], []>} : vector<16x16xbf16>, vector<16x128xbf16>, vector<16x128xf32> -> vector<16x128xf32>
    %c0_98 = arith.constant 0 : index
    %c0_99 = arith.constant 0 : index
    %110 = vector.load %arg5[%c0_98, %c0_99] : memref<16x1xf32, #tpu.memory_space<vmem>>, vector<16x1xf32>
    %111 = vector.broadcast %110 : vector<16x1xf32> to vector<16x128xf32>
    %112 = arith.addf %109, %111 : vector<16x128xf32>
    %cst_100 = arith.constant 0.000000e+00 : f32
    %113 = vector.broadcast %cst_100 : f32 to vector<16x128xf32>
    %114 = arith.maximumf %112, %113 : vector<16x128xf32>
    %c0_101 = arith.constant 0 : index
    %c0_102 = arith.constant 0 : index
    %115 = vector.load %arg6[%c0_101, %c0_102] : memref<16x128xf32, #tpu.memory_space<vmem>>, vector<16x128xf32>
    %116 = arith.maximumf %115, %114 : vector<16x128xf32>
    %c0_103 = arith.constant 0 : index
    %c0_104 = arith.constant 0 : index
    %117 = vector.load %arg6[%c0_103, %c0_104] : memref<16x128xf32, #tpu.memory_space<vmem>>, vector<16x128xf32>
    tpu.vector_store %arg6[%c0_103, %c0_104], %116 {strides = array<i32>} : memref<16x128xf32, #tpu.memory_space<vmem>>, vector<16x128xf32>,
    %c6 = arith.constant 6 : index
    %c0_105 = arith.constant 0 : index
    %c0_106 = arith.constant 0 : index
    %118 = vector.load %arg1[%c6, %c0_105, %c0_106] : memref<8x16x128xbf16, #tpu.memory_space<vmem>>, vector<1x16x128xbf16>
    %119 = vector.shape_cast %118 : vector<1x16x128xbf16> to vector<16x128xbf16>
    %c0_107 = arith.constant 0 : index
    %c0_108 = arith.constant 0 : index
    %120 = vector.load %arg2[%c0_107, %c0_108] : memref<16x16xbf16, #tpu.memory_space<vmem>>, vector<16x16xbf16>
    %cst_109 = arith.constant dense<0.000000e+00> : vector<16x128xf32>
    %121 = tpu.matmul %120, %119, %cst_109 {dimension_numbers = #tpu.dot_dimension_numbers<[1], [0], [0], [1], [0, 0, 1, 1], [], []>} : vector<16x16xbf16>, vector<16x128xbf16>, vector<16x128xf32> -> vector<16x128xf32>
    %c0_110 = arith.constant 0 : index
    %c0_111 = arith.constant 0 : index
    %122 = vector.load %arg4[%c0_110, %c0_111] : memref<16x1xf32, #tpu.memory_space<vmem>>, vector<16x1xf32>
    %123 = vector.broadcast %122 : vector<16x1xf32> to vector<16x128xf32>
    %124 = arith.addf %121, %123 : vector<16x128xf32>
    %cst_112 = arith.constant 0.000000e+00 : f32
    %125 = vector.broadcast %cst_112 : f32 to vector<16x128xf32>
    %126 = arith.maximumf %124, %125 : vector<16x128xf32>
    %127 = arith.truncf %126 : vector<16x128xf32> to vector<16x128xbf16>
    %c0_113 = arith.constant 0 : index
    %c0_114 = arith.constant 0 : index
    %128 = vector.load %arg3[%c0_113, %c0_114] : memref<16x16xbf16, #tpu.memory_space<vmem>>, vector<16x16xbf16>
    %cst_115 = arith.constant dense<0.000000e+00> : vector<16x128xf32>
    %129 = tpu.matmul %128, %127, %cst_115 {dimension_numbers = #tpu.dot_dimension_numbers<[1], [0], [0], [1], [0, 0, 1, 1], [], []>} : vector<16x16xbf16>, vector<16x128xbf16>, vector<16x128xf32> -> vector<16x128xf32>
    %c0_116 = arith.constant 0 : index
    %c0_117 = arith.constant 0 : index
    %130 = vector.load %arg5[%c0_116, %c0_117] : memref<16x1xf32, #tpu.memory_space<vmem>>, vector<16x1xf32>
    %131 = vector.broadcast %130 : vector<16x1xf32> to vector<16x128xf32>
    %132 = arith.addf %129, %131 : vector<16x128xf32>
    %cst_118 = arith.constant 0.000000e+00 : f32
    %133 = vector.broadcast %cst_118 : f32 to vector<16x128xf32>
    %134 = arith.maximumf %132, %133 : vector<16x128xf32>
    %c0_119 = arith.constant 0 : index
    %c0_120 = arith.constant 0 : index
    %135 = vector.load %arg6[%c0_119, %c0_120] : memref<16x128xf32, #tpu.memory_space<vmem>>, vector<16x128xf32>
    %136 = arith.maximumf %135, %134 : vector<16x128xf32>
    %c0_121 = arith.constant 0 : index
    %c0_122 = arith.constant 0 : index
    %137 = vector.load %arg6[%c0_121, %c0_122] : memref<16x128xf32, #tpu.memory_space<vmem>>, vector<16x128xf32>
    tpu.vector_store %arg6[%c0_121, %c0_122], %136 {strides = array<i32>} : memref<16x128xf32, #tpu.memory_space<vmem>>, vector<16x128xf32>,
    %c7 = arith.constant 7 : index
    %c0_123 = arith.constant 0 : index
    %c0_124 = arith.constant 0 : index
    %138 = vector.load %arg1[%c7, %c0_123, %c0_124] : memref<8x16x128xbf16, #tpu.memory_space<vmem>>, vector<1x16x128xbf16>
    %139 = vector.shape_cast %138 : vector<1x16x128xbf16> to vector<16x128xbf16>
    %c0_125 = arith.constant 0 : index
    %c0_126 = arith.constant 0 : index
    %140 = vector.load %arg2[%c0_125, %c0_126] : memref<16x16xbf16, #tpu.memory_space<vmem>>, vector<16x16xbf16>
    %cst_127 = arith.constant dense<0.000000e+00> : vector<16x128xf32>
    %141 = tpu.matmul %140, %139, %cst_127 {dimension_numbers = #tpu.dot_dimension_numbers<[1], [0], [0], [1], [0, 0, 1, 1], [], []>} : vector<16x16xbf16>, vector<16x128xbf16>, vector<16x128xf32> -> vector<16x128xf32>
    %c0_128 = arith.constant 0 : index
    %c0_129 = arith.constant 0 : index
    %142 = vector.load %arg4[%c0_128, %c0_129] : memref<16x1xf32, #tpu.memory_space<vmem>>, vector<16x1xf32>
    %143 = vector.broadcast %142 : vector<16x1xf32> to vector<16x128xf32>
    %144 = arith.addf %141, %143 : vector<16x128xf32>
    %cst_130 = arith.constant 0.000000e+00 : f32
    %145 = vector.broadcast %cst_130 : f32 to vector<16x128xf32>
    %146 = arith.maximumf %144, %145 : vector<16x128xf32>
    %147 = arith.truncf %146 : vector<16x128xf32> to vector<16x128xbf16>
    %c0_131 = arith.constant 0 : index
    %c0_132 = arith.constant 0 : index
    %148 = vector.load %arg3[%c0_131, %c0_132] : memref<16x16xbf16, #tpu.memory_space<vmem>>, vector<16x16xbf16>
    %cst_133 = arith.constant dense<0.000000e+00> : vector<16x128xf32>
    %149 = tpu.matmul %148, %147, %cst_133 {dimension_numbers = #tpu.dot_dimension_numbers<[1], [0], [0], [1], [0, 0, 1, 1], [], []>} : vector<16x16xbf16>, vector<16x128xbf16>, vector<16x128xf32> -> vector<16x128xf32>
    %c0_134 = arith.constant 0 : index
    %c0_135 = arith.constant 0 : index
    %150 = vector.load %arg5[%c0_134, %c0_135] : memref<16x1xf32, #tpu.memory_space<vmem>>, vector<16x1xf32>
    %151 = vector.broadcast %150 : vector<16x1xf32> to vector<16x128xf32>
    %152 = arith.addf %149, %151 : vector<16x128xf32>
    %cst_136 = arith.constant 0.000000e+00 : f32
    %153 = vector.broadcast %cst_136 : f32 to vector<16x128xf32>
    %154 = arith.maximumf %152, %153 : vector<16x128xf32>
    %c0_137 = arith.constant 0 : index
    %c0_138 = arith.constant 0 : index
    %155 = vector.load %arg6[%c0_137, %c0_138] : memref<16x128xf32, #tpu.memory_space<vmem>>, vector<16x128xf32>
    %156 = arith.maximumf %155, %154 : vector<16x128xf32>
    %c0_139 = arith.constant 0 : index
    %c0_140 = arith.constant 0 : index
    %157 = vector.load %arg6[%c0_139, %c0_140] : memref<16x128xf32, #tpu.memory_space<vmem>>, vector<16x128xf32>
    tpu.vector_store %arg6[%c0_139, %c0_140], %156 {strides = array<i32>} : memref<16x128xf32, #tpu.memory_space<vmem>>, vector<16x128xf32>,
    return
  }
  func.func @transform_0(%arg0: i32) -> (i32, i32, i32) {
    %c0_i32 = arith.constant 0 : i32
    %c0_i32_0 = arith.constant 0 : i32
    %c0_i32_1 = arith.constant 0 : i32
    return %c0_i32, %c0_i32_0, %arg0 : i32, i32, i32
  }
  func.func @transform_1(%arg0: i32) -> (i32, i32) {
    %c0_i32 = arith.constant 0 : i32
    %c0_i32_0 = arith.constant 0 : i32
    %c0_i32_1 = arith.constant 0 : i32
    return %c0_i32, %c0_i32_0 : i32, i32
  }
  func.func @transform_2(%arg0: i32) -> (i32, i32) {
    %c0_i32 = arith.constant 0 : i32
    %c0_i32_0 = arith.constant 0 : i32
    %c0_i32_1 = arith.constant 0 : i32
    return %c0_i32, %c0_i32_0 : i32, i32
  }
  func.func @transform_3(%arg0: i32) -> (i32, i32) {
    %c0_i32 = arith.constant 0 : i32
    %c0_i32_0 = arith.constant 0 : i32
    %c0_i32_1 = arith.constant 0 : i32
    return %c0_i32, %c0_i32_0 : i32, i32
  }
  func.func @transform_4(%arg0: i32) -> (i32, i32) {
    %c0_i32 = arith.constant 0 : i32
    %c0_i32_0 = arith.constant 0 : i32
    %c0_i32_1 = arith.constant 0 : i32
    return %c0_i32, %c0_i32_0 : i32, i32
  }
  func.func @transform_5(%arg0: i32) -> (i32, i32) {
    %c0_i32 = arith.constant 0 : i32
    %c0_i32_0 = arith.constant 0 : i32
    return %c0_i32, %arg0 : i32, i32
  }
}

module attributes {stable_mosaic.version = 11 : i64} {
  func.func @kernel(%arg0: i32, %arg1: memref<16x16x128xbf16, #tpu.memory_space<vmem>>, %arg2: memref<16x16xbf16, #tpu.memory_space<vmem>>, %arg3: memref<16x16xbf16, #tpu.memory_space<vmem>>, %arg4: memref<16x1xf32, #tpu.memory_space<vmem>>, %arg5: memref<16x1xf32, #tpu.memory_space<vmem>>, %arg6: memref<16x128xf32, #tpu.memory_space<vmem>>) attributes {dimension_semantics = [#tpu.dimension_semantics<parallel>], iteration_bounds = array<i64: 1>, scalar_prefetch = 0 : i64, scratch_operands = 0 : i64, tpu.core_type = #tpu.core_type<tc>, window_params = [{transform_indices = @transform_0, window_bounds = array<i64: 16, 16, 128>}, {pipeline_mode = #tpu.pipeline_mode<synchronous>, transform_indices = @transform_1, window_bounds = array<i64: 16, 16>}, {pipeline_mode = #tpu.pipeline_mode<synchronous>, transform_indices = @transform_2, window_bounds = array<i64: 16, 16>}, {pipeline_mode = #tpu.pipeline_mode<synchronous>, transform_indices = @transform_3, window_bounds = array<i64: 16, 1>}, {pipeline_mode = #tpu.pipeline_mode<synchronous>, transform_indices = @transform_4, window_bounds = array<i64: 16, 1>}, {transform_indices = @transform_5, window_bounds = array<i64: 16, 128>}]} {
    %c0 = arith.constant 0 : index
    %c0_0 = arith.constant 0 : index
    %c0_1 = arith.constant 0 : index
    %0 = vector.load %arg1[%c0, %c0_0, %c0_1] : memref<16x16x128xbf16, #tpu.memory_space<vmem>>, vector<1x16x128xbf16>
    %1 = vector.shape_cast %0 : vector<1x16x128xbf16> to vector<16x128xbf16>
    %c0_2 = arith.constant 0 : index
    %c0_3 = arith.constant 0 : index
    %2 = vector.load %arg2[%c0_2, %c0_3] : memref<16x16xbf16, #tpu.memory_space<vmem>>, vector<16x16xbf16>
    %cst = arith.constant dense<0.000000e+00> : vector<16x128xf32>
    %3 = tpu.matmul %2, %1, %cst {dimension_numbers = #tpu.dot_dimension_numbers<[1], [0], [0], [1], [0, 0, 1, 1], [], []>} : vector<16x16xbf16>, vector<16x128xbf16>, vector<16x128xf32> -> vector<16x128xf32>
    %c0_4 = arith.constant 0 : index
    %c0_5 = arith.constant 0 : index
    %4 = vector.load %arg4[%c0_4, %c0_5] : memref<16x1xf32, #tpu.memory_space<vmem>>, vector<16x1xf32>
    %5 = vector.broadcast %4 : vector<16x1xf32> to vector<16x128xf32>
    %6 = arith.addf %3, %5 : vector<16x128xf32>
    %cst_6 = arith.constant 0.000000e+00 : f32
    %7 = vector.broadcast %cst_6 : f32 to vector<16x128xf32>
    %8 = arith.maximumf %6, %7 : vector<16x128xf32>
    %9 = arith.truncf %8 : vector<16x128xf32> to vector<16x128xbf16>
    %c0_7 = arith.constant 0 : index
    %c0_8 = arith.constant 0 : index
    %10 = vector.load %arg3[%c0_7, %c0_8] : memref<16x16xbf16, #tpu.memory_space<vmem>>, vector<16x16xbf16>
    %cst_9 = arith.constant dense<0.000000e+00> : vector<16x128xf32>
    %11 = tpu.matmul %10, %9, %cst_9 {dimension_numbers = #tpu.dot_dimension_numbers<[1], [0], [0], [1], [0, 0, 1, 1], [], []>} : vector<16x16xbf16>, vector<16x128xbf16>, vector<16x128xf32> -> vector<16x128xf32>
    %c0_10 = arith.constant 0 : index
    %c0_11 = arith.constant 0 : index
    %12 = vector.load %arg5[%c0_10, %c0_11] : memref<16x1xf32, #tpu.memory_space<vmem>>, vector<16x1xf32>
    %13 = vector.broadcast %12 : vector<16x1xf32> to vector<16x128xf32>
    %14 = arith.addf %11, %13 : vector<16x128xf32>
    %cst_12 = arith.constant 0.000000e+00 : f32
    %15 = vector.broadcast %cst_12 : f32 to vector<16x128xf32>
    %16 = arith.maximumf %14, %15 : vector<16x128xf32>
    %c0_13 = arith.constant 0 : index
    %c0_14 = arith.constant 0 : index
    %17 = vector.load %arg6[%c0_13, %c0_14] : memref<16x128xf32, #tpu.memory_space<vmem>>, vector<16x128xf32>
    tpu.vector_store %arg6[%c0_13, %c0_14], %16 {strides = array<i32>} : memref<16x128xf32, #tpu.memory_space<vmem>>, vector<16x128xf32>,
    %c1 = arith.constant 1 : index
    %c0_15 = arith.constant 0 : index
    %c0_16 = arith.constant 0 : index
    %18 = vector.load %arg1[%c1, %c0_15, %c0_16] : memref<16x16x128xbf16, #tpu.memory_space<vmem>>, vector<1x16x128xbf16>
    %19 = vector.shape_cast %18 : vector<1x16x128xbf16> to vector<16x128xbf16>
    %c0_17 = arith.constant 0 : index
    %c0_18 = arith.constant 0 : index
    %20 = vector.load %arg2[%c0_17, %c0_18] : memref<16x16xbf16, #tpu.memory_space<vmem>>, vector<16x16xbf16>
    %cst_19 = arith.constant dense<0.000000e+00> : vector<16x128xf32>
    %21 = tpu.matmul %20, %19, %cst_19 {dimension_numbers = #tpu.dot_dimension_numbers<[1], [0], [0], [1], [0, 0, 1, 1], [], []>} : vector<16x16xbf16>, vector<16x128xbf16>, vector<16x128xf32> -> vector<16x128xf32>
    %c0_20 = arith.constant 0 : index
    %c0_21 = arith.constant 0 : index
    %22 = vector.load %arg4[%c0_20, %c0_21] : memref<16x1xf32, #tpu.memory_space<vmem>>, vector<16x1xf32>
    %23 = vector.broadcast %22 : vector<16x1xf32> to vector<16x128xf32>
    %24 = arith.addf %21, %23 : vector<16x128xf32>
    %cst_22 = arith.constant 0.000000e+00 : f32
    %25 = vector.broadcast %cst_22 : f32 to vector<16x128xf32>
    %26 = arith.maximumf %24, %25 : vector<16x128xf32>
    %27 = arith.truncf %26 : vector<16x128xf32> to vector<16x128xbf16>
    %c0_23 = arith.constant 0 : index
    %c0_24 = arith.constant 0 : index
    %28 = vector.load %arg3[%c0_23, %c0_24] : memref<16x16xbf16, #tpu.memory_space<vmem>>, vector<16x16xbf16>
    %cst_25 = arith.constant dense<0.000000e+00> : vector<16x128xf32>
    %29 = tpu.matmul %28, %27, %cst_25 {dimension_numbers = #tpu.dot_dimension_numbers<[1], [0], [0], [1], [0, 0, 1, 1], [], []>} : vector<16x16xbf16>, vector<16x128xbf16>, vector<16x128xf32> -> vector<16x128xf32>
    %c0_26 = arith.constant 0 : index
    %c0_27 = arith.constant 0 : index
    %30 = vector.load %arg5[%c0_26, %c0_27] : memref<16x1xf32, #tpu.memory_space<vmem>>, vector<16x1xf32>
    %31 = vector.broadcast %30 : vector<16x1xf32> to vector<16x128xf32>
    %32 = arith.addf %29, %31 : vector<16x128xf32>
    %cst_28 = arith.constant 0.000000e+00 : f32
    %33 = vector.broadcast %cst_28 : f32 to vector<16x128xf32>
    %34 = arith.maximumf %32, %33 : vector<16x128xf32>
    %c0_29 = arith.constant 0 : index
    %c0_30 = arith.constant 0 : index
    %35 = vector.load %arg6[%c0_29, %c0_30] : memref<16x128xf32, #tpu.memory_space<vmem>>, vector<16x128xf32>
    %36 = arith.maximumf %35, %34 : vector<16x128xf32>
    %c0_31 = arith.constant 0 : index
    %c0_32 = arith.constant 0 : index
    %37 = vector.load %arg6[%c0_31, %c0_32] : memref<16x128xf32, #tpu.memory_space<vmem>>, vector<16x128xf32>
    tpu.vector_store %arg6[%c0_31, %c0_32], %36 {strides = array<i32>} : memref<16x128xf32, #tpu.memory_space<vmem>>, vector<16x128xf32>,
    %c2 = arith.constant 2 : index
    %c0_33 = arith.constant 0 : index
    %c0_34 = arith.constant 0 : index
    %38 = vector.load %arg1[%c2, %c0_33, %c0_34] : memref<16x16x128xbf16, #tpu.memory_space<vmem>>, vector<1x16x128xbf16>
    %39 = vector.shape_cast %38 : vector<1x16x128xbf16> to vector<16x128xbf16>
    %c0_35 = arith.constant 0 : index
    %c0_36 = arith.constant 0 : index
    %40 = vector.load %arg2[%c0_35, %c0_36] : memref<16x16xbf16, #tpu.memory_space<vmem>>, vector<16x16xbf16>
    %cst_37 = arith.constant dense<0.000000e+00> : vector<16x128xf32>
    %41 = tpu.matmul %40, %39, %cst_37 {dimension_numbers = #tpu.dot_dimension_numbers<[1], [0], [0], [1], [0, 0, 1, 1], [], []>} : vector<16x16xbf16>, vector<16x128xbf16>, vector<16x128xf32> -> vector<16x128xf32>
    %c0_38 = arith.constant 0 : index
    %c0_39 = arith.constant 0 : index
    %42 = vector.load %arg4[%c0_38, %c0_39] : memref<16x1xf32, #tpu.memory_space<vmem>>, vector<16x1xf32>
    %43 = vector.broadcast %42 : vector<16x1xf32> to vector<16x128xf32>
    %44 = arith.addf %41, %43 : vector<16x128xf32>
    %cst_40 = arith.constant 0.000000e+00 : f32
    %45 = vector.broadcast %cst_40 : f32 to vector<16x128xf32>
    %46 = arith.maximumf %44, %45 : vector<16x128xf32>
    %47 = arith.truncf %46 : vector<16x128xf32> to vector<16x128xbf16>
    %c0_41 = arith.constant 0 : index
    %c0_42 = arith.constant 0 : index
    %48 = vector.load %arg3[%c0_41, %c0_42] : memref<16x16xbf16, #tpu.memory_space<vmem>>, vector<16x16xbf16>
    %cst_43 = arith.constant dense<0.000000e+00> : vector<16x128xf32>
    %49 = tpu.matmul %48, %47, %cst_43 {dimension_numbers = #tpu.dot_dimension_numbers<[1], [0], [0], [1], [0, 0, 1, 1], [], []>} : vector<16x16xbf16>, vector<16x128xbf16>, vector<16x128xf32> -> vector<16x128xf32>
    %c0_44 = arith.constant 0 : index
    %c0_45 = arith.constant 0 : index
    %50 = vector.load %arg5[%c0_44, %c0_45] : memref<16x1xf32, #tpu.memory_space<vmem>>, vector<16x1xf32>
    %51 = vector.broadcast %50 : vector<16x1xf32> to vector<16x128xf32>
    %52 = arith.addf %49, %51 : vector<16x128xf32>
    %cst_46 = arith.constant 0.000000e+00 : f32
    %53 = vector.broadcast %cst_46 : f32 to vector<16x128xf32>
    %54 = arith.maximumf %52, %53 : vector<16x128xf32>
    %c0_47 = arith.constant 0 : index
    %c0_48 = arith.constant 0 : index
    %55 = vector.load %arg6[%c0_47, %c0_48] : memref<16x128xf32, #tpu.memory_space<vmem>>, vector<16x128xf32>
    %56 = arith.maximumf %55, %54 : vector<16x128xf32>
    %c0_49 = arith.constant 0 : index
    %c0_50 = arith.constant 0 : index
    %57 = vector.load %arg6[%c0_49, %c0_50] : memref<16x128xf32, #tpu.memory_space<vmem>>, vector<16x128xf32>
    tpu.vector_store %arg6[%c0_49, %c0_50], %56 {strides = array<i32>} : memref<16x128xf32, #tpu.memory_space<vmem>>, vector<16x128xf32>,
    %c3 = arith.constant 3 : index
    %c0_51 = arith.constant 0 : index
    %c0_52 = arith.constant 0 : index
    %58 = vector.load %arg1[%c3, %c0_51, %c0_52] : memref<16x16x128xbf16, #tpu.memory_space<vmem>>, vector<1x16x128xbf16>
    %59 = vector.shape_cast %58 : vector<1x16x128xbf16> to vector<16x128xbf16>
    %c0_53 = arith.constant 0 : index
    %c0_54 = arith.constant 0 : index
    %60 = vector.load %arg2[%c0_53, %c0_54] : memref<16x16xbf16, #tpu.memory_space<vmem>>, vector<16x16xbf16>
    %cst_55 = arith.constant dense<0.000000e+00> : vector<16x128xf32>
    %61 = tpu.matmul %60, %59, %cst_55 {dimension_numbers = #tpu.dot_dimension_numbers<[1], [0], [0], [1], [0, 0, 1, 1], [], []>} : vector<16x16xbf16>, vector<16x128xbf16>, vector<16x128xf32> -> vector<16x128xf32>
    %c0_56 = arith.constant 0 : index
    %c0_57 = arith.constant 0 : index
    %62 = vector.load %arg4[%c0_56, %c0_57] : memref<16x1xf32, #tpu.memory_space<vmem>>, vector<16x1xf32>
    %63 = vector.broadcast %62 : vector<16x1xf32> to vector<16x128xf32>
    %64 = arith.addf %61, %63 : vector<16x128xf32>
    %cst_58 = arith.constant 0.000000e+00 : f32
    %65 = vector.broadcast %cst_58 : f32 to vector<16x128xf32>
    %66 = arith.maximumf %64, %65 : vector<16x128xf32>
    %67 = arith.truncf %66 : vector<16x128xf32> to vector<16x128xbf16>
    %c0_59 = arith.constant 0 : index
    %c0_60 = arith.constant 0 : index
    %68 = vector.load %arg3[%c0_59, %c0_60] : memref<16x16xbf16, #tpu.memory_space<vmem>>, vector<16x16xbf16>
    %cst_61 = arith.constant dense<0.000000e+00> : vector<16x128xf32>
    %69 = tpu.matmul %68, %67, %cst_61 {dimension_numbers = #tpu.dot_dimension_numbers<[1], [0], [0], [1], [0, 0, 1, 1], [], []>} : vector<16x16xbf16>, vector<16x128xbf16>, vector<16x128xf32> -> vector<16x128xf32>
    %c0_62 = arith.constant 0 : index
    %c0_63 = arith.constant 0 : index
    %70 = vector.load %arg5[%c0_62, %c0_63] : memref<16x1xf32, #tpu.memory_space<vmem>>, vector<16x1xf32>
    %71 = vector.broadcast %70 : vector<16x1xf32> to vector<16x128xf32>
    %72 = arith.addf %69, %71 : vector<16x128xf32>
    %cst_64 = arith.constant 0.000000e+00 : f32
    %73 = vector.broadcast %cst_64 : f32 to vector<16x128xf32>
    %74 = arith.maximumf %72, %73 : vector<16x128xf32>
    %c0_65 = arith.constant 0 : index
    %c0_66 = arith.constant 0 : index
    %75 = vector.load %arg6[%c0_65, %c0_66] : memref<16x128xf32, #tpu.memory_space<vmem>>, vector<16x128xf32>
    %76 = arith.maximumf %75, %74 : vector<16x128xf32>
    %c0_67 = arith.constant 0 : index
    %c0_68 = arith.constant 0 : index
    %77 = vector.load %arg6[%c0_67, %c0_68] : memref<16x128xf32, #tpu.memory_space<vmem>>, vector<16x128xf32>
    tpu.vector_store %arg6[%c0_67, %c0_68], %76 {strides = array<i32>} : memref<16x128xf32, #tpu.memory_space<vmem>>, vector<16x128xf32>,
    %c4 = arith.constant 4 : index
    %c0_69 = arith.constant 0 : index
    %c0_70 = arith.constant 0 : index
    %78 = vector.load %arg1[%c4, %c0_69, %c0_70] : memref<16x16x128xbf16, #tpu.memory_space<vmem>>, vector<1x16x128xbf16>
    %79 = vector.shape_cast %78 : vector<1x16x128xbf16> to vector<16x128xbf16>
    %c0_71 = arith.constant 0 : index
    %c0_72 = arith.constant 0 : index
    %80 = vector.load %arg2[%c0_71, %c0_72] : memref<16x16xbf16, #tpu.memory_space<vmem>>, vector<16x16xbf16>
    %cst_73 = arith.constant dense<0.000000e+00> : vector<16x128xf32>
    %81 = tpu.matmul %80, %79, %cst_73 {dimension_numbers = #tpu.dot_dimension_numbers<[1], [0], [0], [1], [0, 0, 1, 1], [], []>} : vector<16x16xbf16>, vector<16x128xbf16>, vector<16x128xf32> -> vector<16x128xf32>
    %c0_74 = arith.constant 0 : index
    %c0_75 = arith.constant 0 : index
    %82 = vector.load %arg4[%c0_74, %c0_75] : memref<16x1xf32, #tpu.memory_space<vmem>>, vector<16x1xf32>
    %83 = vector.broadcast %82 : vector<16x1xf32> to vector<16x128xf32>
    %84 = arith.addf %81, %83 : vector<16x128xf32>
    %cst_76 = arith.constant 0.000000e+00 : f32
    %85 = vector.broadcast %cst_76 : f32 to vector<16x128xf32>
    %86 = arith.maximumf %84, %85 : vector<16x128xf32>
    %87 = arith.truncf %86 : vector<16x128xf32> to vector<16x128xbf16>
    %c0_77 = arith.constant 0 : index
    %c0_78 = arith.constant 0 : index
    %88 = vector.load %arg3[%c0_77, %c0_78] : memref<16x16xbf16, #tpu.memory_space<vmem>>, vector<16x16xbf16>
    %cst_79 = arith.constant dense<0.000000e+00> : vector<16x128xf32>
    %89 = tpu.matmul %88, %87, %cst_79 {dimension_numbers = #tpu.dot_dimension_numbers<[1], [0], [0], [1], [0, 0, 1, 1], [], []>} : vector<16x16xbf16>, vector<16x128xbf16>, vector<16x128xf32> -> vector<16x128xf32>
    %c0_80 = arith.constant 0 : index
    %c0_81 = arith.constant 0 : index
    %90 = vector.load %arg5[%c0_80, %c0_81] : memref<16x1xf32, #tpu.memory_space<vmem>>, vector<16x1xf32>
    %91 = vector.broadcast %90 : vector<16x1xf32> to vector<16x128xf32>
    %92 = arith.addf %89, %91 : vector<16x128xf32>
    %cst_82 = arith.constant 0.000000e+00 : f32
    %93 = vector.broadcast %cst_82 : f32 to vector<16x128xf32>
    %94 = arith.maximumf %92, %93 : vector<16x128xf32>
    %c0_83 = arith.constant 0 : index
    %c0_84 = arith.constant 0 : index
    %95 = vector.load %arg6[%c0_83, %c0_84] : memref<16x128xf32, #tpu.memory_space<vmem>>, vector<16x128xf32>
    %96 = arith.maximumf %95, %94 : vector<16x128xf32>
    %c0_85 = arith.constant 0 : index
    %c0_86 = arith.constant 0 : index
    %97 = vector.load %arg6[%c0_85, %c0_86] : memref<16x128xf32, #tpu.memory_space<vmem>>, vector<16x128xf32>
    tpu.vector_store %arg6[%c0_85, %c0_86], %96 {strides = array<i32>} : memref<16x128xf32, #tpu.memory_space<vmem>>, vector<16x128xf32>,
    %c5 = arith.constant 5 : index
    %c0_87 = arith.constant 0 : index
    %c0_88 = arith.constant 0 : index
    %98 = vector.load %arg1[%c5, %c0_87, %c0_88] : memref<16x16x128xbf16, #tpu.memory_space<vmem>>, vector<1x16x128xbf16>
    %99 = vector.shape_cast %98 : vector<1x16x128xbf16> to vector<16x128xbf16>
    %c0_89 = arith.constant 0 : index
    %c0_90 = arith.constant 0 : index
    %100 = vector.load %arg2[%c0_89, %c0_90] : memref<16x16xbf16, #tpu.memory_space<vmem>>, vector<16x16xbf16>
    %cst_91 = arith.constant dense<0.000000e+00> : vector<16x128xf32>
    %101 = tpu.matmul %100, %99, %cst_91 {dimension_numbers = #tpu.dot_dimension_numbers<[1], [0], [0], [1], [0, 0, 1, 1], [], []>} : vector<16x16xbf16>, vector<16x128xbf16>, vector<16x128xf32> -> vector<16x128xf32>
    %c0_92 = arith.constant 0 : index
    %c0_93 = arith.constant 0 : index
    %102 = vector.load %arg4[%c0_92, %c0_93] : memref<16x1xf32, #tpu.memory_space<vmem>>, vector<16x1xf32>
    %103 = vector.broadcast %102 : vector<16x1xf32> to vector<16x128xf32>
    %104 = arith.addf %101, %103 : vector<16x128xf32>
    %cst_94 = arith.constant 0.000000e+00 : f32
    %105 = vector.broadcast %cst_94 : f32 to vector<16x128xf32>
    %106 = arith.maximumf %104, %105 : vector<16x128xf32>
    %107 = arith.truncf %106 : vector<16x128xf32> to vector<16x128xbf16>
    %c0_95 = arith.constant 0 : index
    %c0_96 = arith.constant 0 : index
    %108 = vector.load %arg3[%c0_95, %c0_96] : memref<16x16xbf16, #tpu.memory_space<vmem>>, vector<16x16xbf16>
    %cst_97 = arith.constant dense<0.000000e+00> : vector<16x128xf32>
    %109 = tpu.matmul %108, %107, %cst_97 {dimension_numbers = #tpu.dot_dimension_numbers<[1], [0], [0], [1], [0, 0, 1, 1], [], []>} : vector<16x16xbf16>, vector<16x128xbf16>, vector<16x128xf32> -> vector<16x128xf32>
    %c0_98 = arith.constant 0 : index
    %c0_99 = arith.constant 0 : index
    %110 = vector.load %arg5[%c0_98, %c0_99] : memref<16x1xf32, #tpu.memory_space<vmem>>, vector<16x1xf32>
    %111 = vector.broadcast %110 : vector<16x1xf32> to vector<16x128xf32>
    %112 = arith.addf %109, %111 : vector<16x128xf32>
    %cst_100 = arith.constant 0.000000e+00 : f32
    %113 = vector.broadcast %cst_100 : f32 to vector<16x128xf32>
    %114 = arith.maximumf %112, %113 : vector<16x128xf32>
    %c0_101 = arith.constant 0 : index
    %c0_102 = arith.constant 0 : index
    %115 = vector.load %arg6[%c0_101, %c0_102] : memref<16x128xf32, #tpu.memory_space<vmem>>, vector<16x128xf32>
    %116 = arith.maximumf %115, %114 : vector<16x128xf32>
    %c0_103 = arith.constant 0 : index
    %c0_104 = arith.constant 0 : index
    %117 = vector.load %arg6[%c0_103, %c0_104] : memref<16x128xf32, #tpu.memory_space<vmem>>, vector<16x128xf32>
    tpu.vector_store %arg6[%c0_103, %c0_104], %116 {strides = array<i32>} : memref<16x128xf32, #tpu.memory_space<vmem>>, vector<16x128xf32>,
    %c6 = arith.constant 6 : index
    %c0_105 = arith.constant 0 : index
    %c0_106 = arith.constant 0 : index
    %118 = vector.load %arg1[%c6, %c0_105, %c0_106] : memref<16x16x128xbf16, #tpu.memory_space<vmem>>, vector<1x16x128xbf16>
    %119 = vector.shape_cast %118 : vector<1x16x128xbf16> to vector<16x128xbf16>
    %c0_107 = arith.constant 0 : index
    %c0_108 = arith.constant 0 : index
    %120 = vector.load %arg2[%c0_107, %c0_108] : memref<16x16xbf16, #tpu.memory_space<vmem>>, vector<16x16xbf16>
    %cst_109 = arith.constant dense<0.000000e+00> : vector<16x128xf32>
    %121 = tpu.matmul %120, %119, %cst_109 {dimension_numbers = #tpu.dot_dimension_numbers<[1], [0], [0], [1], [0, 0, 1, 1], [], []>} : vector<16x16xbf16>, vector<16x128xbf16>, vector<16x128xf32> -> vector<16x128xf32>
    %c0_110 = arith.constant 0 : index
    %c0_111 = arith.constant 0 : index
    %122 = vector.load %arg4[%c0_110, %c0_111] : memref<16x1xf32, #tpu.memory_space<vmem>>, vector<16x1xf32>
    %123 = vector.broadcast %122 : vector<16x1xf32> to vector<16x128xf32>
    %124 = arith.addf %121, %123 : vector<16x128xf32>
    %cst_112 = arith.constant 0.000000e+00 : f32
    %125 = vector.broadcast %cst_112 : f32 to vector<16x128xf32>
    %126 = arith.maximumf %124, %125 : vector<16x128xf32>
    %127 = arith.truncf %126 : vector<16x128xf32> to vector<16x128xbf16>
    %c0_113 = arith.constant 0 : index
    %c0_114 = arith.constant 0 : index
    %128 = vector.load %arg3[%c0_113, %c0_114] : memref<16x16xbf16, #tpu.memory_space<vmem>>, vector<16x16xbf16>
    %cst_115 = arith.constant dense<0.000000e+00> : vector<16x128xf32>
    %129 = tpu.matmul %128, %127, %cst_115 {dimension_numbers = #tpu.dot_dimension_numbers<[1], [0], [0], [1], [0, 0, 1, 1], [], []>} : vector<16x16xbf16>, vector<16x128xbf16>, vector<16x128xf32> -> vector<16x128xf32>
    %c0_116 = arith.constant 0 : index
    %c0_117 = arith.constant 0 : index
    %130 = vector.load %arg5[%c0_116, %c0_117] : memref<16x1xf32, #tpu.memory_space<vmem>>, vector<16x1xf32>
    %131 = vector.broadcast %130 : vector<16x1xf32> to vector<16x128xf32>
    %132 = arith.addf %129, %131 : vector<16x128xf32>
    %cst_118 = arith.constant 0.000000e+00 : f32
    %133 = vector.broadcast %cst_118 : f32 to vector<16x128xf32>
    %134 = arith.maximumf %132, %133 : vector<16x128xf32>
    %c0_119 = arith.constant 0 : index
    %c0_120 = arith.constant 0 : index
    %135 = vector.load %arg6[%c0_119, %c0_120] : memref<16x128xf32, #tpu.memory_space<vmem>>, vector<16x128xf32>
    %136 = arith.maximumf %135, %134 : vector<16x128xf32>
    %c0_121 = arith.constant 0 : index
    %c0_122 = arith.constant 0 : index
    %137 = vector.load %arg6[%c0_121, %c0_122] : memref<16x128xf32, #tpu.memory_space<vmem>>, vector<16x128xf32>
    tpu.vector_store %arg6[%c0_121, %c0_122], %136 {strides = array<i32>} : memref<16x128xf32, #tpu.memory_space<vmem>>, vector<16x128xf32>,
    %c7 = arith.constant 7 : index
    %c0_123 = arith.constant 0 : index
    %c0_124 = arith.constant 0 : index
    %138 = vector.load %arg1[%c7, %c0_123, %c0_124] : memref<16x16x128xbf16, #tpu.memory_space<vmem>>, vector<1x16x128xbf16>
    %139 = vector.shape_cast %138 : vector<1x16x128xbf16> to vector<16x128xbf16>
    %c0_125 = arith.constant 0 : index
    %c0_126 = arith.constant 0 : index
    %140 = vector.load %arg2[%c0_125, %c0_126] : memref<16x16xbf16, #tpu.memory_space<vmem>>, vector<16x16xbf16>
    %cst_127 = arith.constant dense<0.000000e+00> : vector<16x128xf32>
    %141 = tpu.matmul %140, %139, %cst_127 {dimension_numbers = #tpu.dot_dimension_numbers<[1], [0], [0], [1], [0, 0, 1, 1], [], []>} : vector<16x16xbf16>, vector<16x128xbf16>, vector<16x128xf32> -> vector<16x128xf32>
    %c0_128 = arith.constant 0 : index
    %c0_129 = arith.constant 0 : index
    %142 = vector.load %arg4[%c0_128, %c0_129] : memref<16x1xf32, #tpu.memory_space<vmem>>, vector<16x1xf32>
    %143 = vector.broadcast %142 : vector<16x1xf32> to vector<16x128xf32>
    %144 = arith.addf %141, %143 : vector<16x128xf32>
    %cst_130 = arith.constant 0.000000e+00 : f32
    %145 = vector.broadcast %cst_130 : f32 to vector<16x128xf32>
    %146 = arith.maximumf %144, %145 : vector<16x128xf32>
    %147 = arith.truncf %146 : vector<16x128xf32> to vector<16x128xbf16>
    %c0_131 = arith.constant 0 : index
    %c0_132 = arith.constant 0 : index
    %148 = vector.load %arg3[%c0_131, %c0_132] : memref<16x16xbf16, #tpu.memory_space<vmem>>, vector<16x16xbf16>
    %cst_133 = arith.constant dense<0.000000e+00> : vector<16x128xf32>
    %149 = tpu.matmul %148, %147, %cst_133 {dimension_numbers = #tpu.dot_dimension_numbers<[1], [0], [0], [1], [0, 0, 1, 1], [], []>} : vector<16x16xbf16>, vector<16x128xbf16>, vector<16x128xf32> -> vector<16x128xf32>
    %c0_134 = arith.constant 0 : index
    %c0_135 = arith.constant 0 : index
    %150 = vector.load %arg5[%c0_134, %c0_135] : memref<16x1xf32, #tpu.memory_space<vmem>>, vector<16x1xf32>
    %151 = vector.broadcast %150 : vector<16x1xf32> to vector<16x128xf32>
    %152 = arith.addf %149, %151 : vector<16x128xf32>
    %cst_136 = arith.constant 0.000000e+00 : f32
    %153 = vector.broadcast %cst_136 : f32 to vector<16x128xf32>
    %154 = arith.maximumf %152, %153 : vector<16x128xf32>
    %c0_137 = arith.constant 0 : index
    %c0_138 = arith.constant 0 : index
    %155 = vector.load %arg6[%c0_137, %c0_138] : memref<16x128xf32, #tpu.memory_space<vmem>>, vector<16x128xf32>
    %156 = arith.maximumf %155, %154 : vector<16x128xf32>
    %c0_139 = arith.constant 0 : index
    %c0_140 = arith.constant 0 : index
    %157 = vector.load %arg6[%c0_139, %c0_140] : memref<16x128xf32, #tpu.memory_space<vmem>>, vector<16x128xf32>
    tpu.vector_store %arg6[%c0_139, %c0_140], %156 {strides = array<i32>} : memref<16x128xf32, #tpu.memory_space<vmem>>, vector<16x128xf32>,
    %c8 = arith.constant 8 : index
    %c0_141 = arith.constant 0 : index
    %c0_142 = arith.constant 0 : index
    %158 = vector.load %arg1[%c8, %c0_141, %c0_142] : memref<16x16x128xbf16, #tpu.memory_space<vmem>>, vector<1x16x128xbf16>
    %159 = vector.shape_cast %158 : vector<1x16x128xbf16> to vector<16x128xbf16>
    %c0_143 = arith.constant 0 : index
    %c0_144 = arith.constant 0 : index
    %160 = vector.load %arg2[%c0_143, %c0_144] : memref<16x16xbf16, #tpu.memory_space<vmem>>, vector<16x16xbf16>
    %cst_145 = arith.constant dense<0.000000e+00> : vector<16x128xf32>
    %161 = tpu.matmul %160, %159, %cst_145 {dimension_numbers = #tpu.dot_dimension_numbers<[1], [0], [0], [1], [0, 0, 1, 1], [], []>} : vector<16x16xbf16>, vector<16x128xbf16>, vector<16x128xf32> -> vector<16x128xf32>
    %c0_146 = arith.constant 0 : index
    %c0_147 = arith.constant 0 : index
    %162 = vector.load %arg4[%c0_146, %c0_147] : memref<16x1xf32, #tpu.memory_space<vmem>>, vector<16x1xf32>
    %163 = vector.broadcast %162 : vector<16x1xf32> to vector<16x128xf32>
    %164 = arith.addf %161, %163 : vector<16x128xf32>
    %cst_148 = arith.constant 0.000000e+00 : f32
    %165 = vector.broadcast %cst_148 : f32 to vector<16x128xf32>
    %166 = arith.maximumf %164, %165 : vector<16x128xf32>
    %167 = arith.truncf %166 : vector<16x128xf32> to vector<16x128xbf16>
    %c0_149 = arith.constant 0 : index
    %c0_150 = arith.constant 0 : index
    %168 = vector.load %arg3[%c0_149, %c0_150] : memref<16x16xbf16, #tpu.memory_space<vmem>>, vector<16x16xbf16>
    %cst_151 = arith.constant dense<0.000000e+00> : vector<16x128xf32>
    %169 = tpu.matmul %168, %167, %cst_151 {dimension_numbers = #tpu.dot_dimension_numbers<[1], [0], [0], [1], [0, 0, 1, 1], [], []>} : vector<16x16xbf16>, vector<16x128xbf16>, vector<16x128xf32> -> vector<16x128xf32>
    %c0_152 = arith.constant 0 : index
    %c0_153 = arith.constant 0 : index
    %170 = vector.load %arg5[%c0_152, %c0_153] : memref<16x1xf32, #tpu.memory_space<vmem>>, vector<16x1xf32>
    %171 = vector.broadcast %170 : vector<16x1xf32> to vector<16x128xf32>
    %172 = arith.addf %169, %171 : vector<16x128xf32>
    %cst_154 = arith.constant 0.000000e+00 : f32
    %173 = vector.broadcast %cst_154 : f32 to vector<16x128xf32>
    %174 = arith.maximumf %172, %173 : vector<16x128xf32>
    %c0_155 = arith.constant 0 : index
    %c0_156 = arith.constant 0 : index
    %175 = vector.load %arg6[%c0_155, %c0_156] : memref<16x128xf32, #tpu.memory_space<vmem>>, vector<16x128xf32>
    %176 = arith.maximumf %175, %174 : vector<16x128xf32>
    %c0_157 = arith.constant 0 : index
    %c0_158 = arith.constant 0 : index
    %177 = vector.load %arg6[%c0_157, %c0_158] : memref<16x128xf32, #tpu.memory_space<vmem>>, vector<16x128xf32>
    tpu.vector_store %arg6[%c0_157, %c0_158], %176 {strides = array<i32>} : memref<16x128xf32, #tpu.memory_space<vmem>>, vector<16x128xf32>,
    %c9 = arith.constant 9 : index
    %c0_159 = arith.constant 0 : index
    %c0_160 = arith.constant 0 : index
    %178 = vector.load %arg1[%c9, %c0_159, %c0_160] : memref<16x16x128xbf16, #tpu.memory_space<vmem>>, vector<1x16x128xbf16>
    %179 = vector.shape_cast %178 : vector<1x16x128xbf16> to vector<16x128xbf16>
    %c0_161 = arith.constant 0 : index
    %c0_162 = arith.constant 0 : index
    %180 = vector.load %arg2[%c0_161, %c0_162] : memref<16x16xbf16, #tpu.memory_space<vmem>>, vector<16x16xbf16>
    %cst_163 = arith.constant dense<0.000000e+00> : vector<16x128xf32>
    %181 = tpu.matmul %180, %179, %cst_163 {dimension_numbers = #tpu.dot_dimension_numbers<[1], [0], [0], [1], [0, 0, 1, 1], [], []>} : vector<16x16xbf16>, vector<16x128xbf16>, vector<16x128xf32> -> vector<16x128xf32>
    %c0_164 = arith.constant 0 : index
    %c0_165 = arith.constant 0 : index
    %182 = vector.load %arg4[%c0_164, %c0_165] : memref<16x1xf32, #tpu.memory_space<vmem>>, vector<16x1xf32>
    %183 = vector.broadcast %182 : vector<16x1xf32> to vector<16x128xf32>
    %184 = arith.addf %181, %183 : vector<16x128xf32>
    %cst_166 = arith.constant 0.000000e+00 : f32
    %185 = vector.broadcast %cst_166 : f32 to vector<16x128xf32>
    %186 = arith.maximumf %184, %185 : vector<16x128xf32>
    %187 = arith.truncf %186 : vector<16x128xf32> to vector<16x128xbf16>
    %c0_167 = arith.constant 0 : index
    %c0_168 = arith.constant 0 : index
    %188 = vector.load %arg3[%c0_167, %c0_168] : memref<16x16xbf16, #tpu.memory_space<vmem>>, vector<16x16xbf16>
    %cst_169 = arith.constant dense<0.000000e+00> : vector<16x128xf32>
    %189 = tpu.matmul %188, %187, %cst_169 {dimension_numbers = #tpu.dot_dimension_numbers<[1], [0], [0], [1], [0, 0, 1, 1], [], []>} : vector<16x16xbf16>, vector<16x128xbf16>, vector<16x128xf32> -> vector<16x128xf32>
    %c0_170 = arith.constant 0 : index
    %c0_171 = arith.constant 0 : index
    %190 = vector.load %arg5[%c0_170, %c0_171] : memref<16x1xf32, #tpu.memory_space<vmem>>, vector<16x1xf32>
    %191 = vector.broadcast %190 : vector<16x1xf32> to vector<16x128xf32>
    %192 = arith.addf %189, %191 : vector<16x128xf32>
    %cst_172 = arith.constant 0.000000e+00 : f32
    %193 = vector.broadcast %cst_172 : f32 to vector<16x128xf32>
    %194 = arith.maximumf %192, %193 : vector<16x128xf32>
    %c0_173 = arith.constant 0 : index
    %c0_174 = arith.constant 0 : index
    %195 = vector.load %arg6[%c0_173, %c0_174] : memref<16x128xf32, #tpu.memory_space<vmem>>, vector<16x128xf32>
    %196 = arith.maximumf %195, %194 : vector<16x128xf32>
    %c0_175 = arith.constant 0 : index
    %c0_176 = arith.constant 0 : index
    %197 = vector.load %arg6[%c0_175, %c0_176] : memref<16x128xf32, #tpu.memory_space<vmem>>, vector<16x128xf32>
    tpu.vector_store %arg6[%c0_175, %c0_176], %196 {strides = array<i32>} : memref<16x128xf32, #tpu.memory_space<vmem>>, vector<16x128xf32>,
    %c10 = arith.constant 10 : index
    %c0_177 = arith.constant 0 : index
    %c0_178 = arith.constant 0 : index
    %198 = vector.load %arg1[%c10, %c0_177, %c0_178] : memref<16x16x128xbf16, #tpu.memory_space<vmem>>, vector<1x16x128xbf16>
    %199 = vector.shape_cast %198 : vector<1x16x128xbf16> to vector<16x128xbf16>
    %c0_179 = arith.constant 0 : index
    %c0_180 = arith.constant 0 : index
    %200 = vector.load %arg2[%c0_179, %c0_180] : memref<16x16xbf16, #tpu.memory_space<vmem>>, vector<16x16xbf16>
    %cst_181 = arith.constant dense<0.000000e+00> : vector<16x128xf32>
    %201 = tpu.matmul %200, %199, %cst_181 {dimension_numbers = #tpu.dot_dimension_numbers<[1], [0], [0], [1], [0, 0, 1, 1], [], []>} : vector<16x16xbf16>, vector<16x128xbf16>, vector<16x128xf32> -> vector<16x128xf32>
    %c0_182 = arith.constant 0 : index
    %c0_183 = arith.constant 0 : index
    %202 = vector.load %arg4[%c0_182, %c0_183] : memref<16x1xf32, #tpu.memory_space<vmem>>, vector<16x1xf32>
    %203 = vector.broadcast %202 : vector<16x1xf32> to vector<16x128xf32>
    %204 = arith.addf %201, %203 : vector<16x128xf32>
    %cst_184 = arith.constant 0.000000e+00 : f32
    %205 = vector.broadcast %cst_184 : f32 to vector<16x128xf32>
    %206 = arith.maximumf %204, %205 : vector<16x128xf32>
    %207 = arith.truncf %206 : vector<16x128xf32> to vector<16x128xbf16>
    %c0_185 = arith.constant 0 : index
    %c0_186 = arith.constant 0 : index
    %208 = vector.load %arg3[%c0_185, %c0_186] : memref<16x16xbf16, #tpu.memory_space<vmem>>, vector<16x16xbf16>
    %cst_187 = arith.constant dense<0.000000e+00> : vector<16x128xf32>
    %209 = tpu.matmul %208, %207, %cst_187 {dimension_numbers = #tpu.dot_dimension_numbers<[1], [0], [0], [1], [0, 0, 1, 1], [], []>} : vector<16x16xbf16>, vector<16x128xbf16>, vector<16x128xf32> -> vector<16x128xf32>
    %c0_188 = arith.constant 0 : index
    %c0_189 = arith.constant 0 : index
    %210 = vector.load %arg5[%c0_188, %c0_189] : memref<16x1xf32, #tpu.memory_space<vmem>>, vector<16x1xf32>
    %211 = vector.broadcast %210 : vector<16x1xf32> to vector<16x128xf32>
    %212 = arith.addf %209, %211 : vector<16x128xf32>
    %cst_190 = arith.constant 0.000000e+00 : f32
    %213 = vector.broadcast %cst_190 : f32 to vector<16x128xf32>
    %214 = arith.maximumf %212, %213 : vector<16x128xf32>
    %c0_191 = arith.constant 0 : index
    %c0_192 = arith.constant 0 : index
    %215 = vector.load %arg6[%c0_191, %c0_192] : memref<16x128xf32, #tpu.memory_space<vmem>>, vector<16x128xf32>
    %216 = arith.maximumf %215, %214 : vector<16x128xf32>
    %c0_193 = arith.constant 0 : index
    %c0_194 = arith.constant 0 : index
    %217 = vector.load %arg6[%c0_193, %c0_194] : memref<16x128xf32, #tpu.memory_space<vmem>>, vector<16x128xf32>
    tpu.vector_store %arg6[%c0_193, %c0_194], %216 {strides = array<i32>} : memref<16x128xf32, #tpu.memory_space<vmem>>, vector<16x128xf32>,
    %c11 = arith.constant 11 : index
    %c0_195 = arith.constant 0 : index
    %c0_196 = arith.constant 0 : index
    %218 = vector.load %arg1[%c11, %c0_195, %c0_196] : memref<16x16x128xbf16, #tpu.memory_space<vmem>>, vector<1x16x128xbf16>
    %219 = vector.shape_cast %218 : vector<1x16x128xbf16> to vector<16x128xbf16>
    %c0_197 = arith.constant 0 : index
    %c0_198 = arith.constant 0 : index
    %220 = vector.load %arg2[%c0_197, %c0_198] : memref<16x16xbf16, #tpu.memory_space<vmem>>, vector<16x16xbf16>
    %cst_199 = arith.constant dense<0.000000e+00> : vector<16x128xf32>
    %221 = tpu.matmul %220, %219, %cst_199 {dimension_numbers = #tpu.dot_dimension_numbers<[1], [0], [0], [1], [0, 0, 1, 1], [], []>} : vector<16x16xbf16>, vector<16x128xbf16>, vector<16x128xf32> -> vector<16x128xf32>
    %c0_200 = arith.constant 0 : index
    %c0_201 = arith.constant 0 : index
    %222 = vector.load %arg4[%c0_200, %c0_201] : memref<16x1xf32, #tpu.memory_space<vmem>>, vector<16x1xf32>
    %223 = vector.broadcast %222 : vector<16x1xf32> to vector<16x128xf32>
    %224 = arith.addf %221, %223 : vector<16x128xf32>
    %cst_202 = arith.constant 0.000000e+00 : f32
    %225 = vector.broadcast %cst_202 : f32 to vector<16x128xf32>
    %226 = arith.maximumf %224, %225 : vector<16x128xf32>
    %227 = arith.truncf %226 : vector<16x128xf32> to vector<16x128xbf16>
    %c0_203 = arith.constant 0 : index
    %c0_204 = arith.constant 0 : index
    %228 = vector.load %arg3[%c0_203, %c0_204] : memref<16x16xbf16, #tpu.memory_space<vmem>>, vector<16x16xbf16>
    %cst_205 = arith.constant dense<0.000000e+00> : vector<16x128xf32>
    %229 = tpu.matmul %228, %227, %cst_205 {dimension_numbers = #tpu.dot_dimension_numbers<[1], [0], [0], [1], [0, 0, 1, 1], [], []>} : vector<16x16xbf16>, vector<16x128xbf16>, vector<16x128xf32> -> vector<16x128xf32>
    %c0_206 = arith.constant 0 : index
    %c0_207 = arith.constant 0 : index
    %230 = vector.load %arg5[%c0_206, %c0_207] : memref<16x1xf32, #tpu.memory_space<vmem>>, vector<16x1xf32>
    %231 = vector.broadcast %230 : vector<16x1xf32> to vector<16x128xf32>
    %232 = arith.addf %229, %231 : vector<16x128xf32>
    %cst_208 = arith.constant 0.000000e+00 : f32
    %233 = vector.broadcast %cst_208 : f32 to vector<16x128xf32>
    %234 = arith.maximumf %232, %233 : vector<16x128xf32>
    %c0_209 = arith.constant 0 : index
    %c0_210 = arith.constant 0 : index
    %235 = vector.load %arg6[%c0_209, %c0_210] : memref<16x128xf32, #tpu.memory_space<vmem>>, vector<16x128xf32>
    %236 = arith.maximumf %235, %234 : vector<16x128xf32>
    %c0_211 = arith.constant 0 : index
    %c0_212 = arith.constant 0 : index
    %237 = vector.load %arg6[%c0_211, %c0_212] : memref<16x128xf32, #tpu.memory_space<vmem>>, vector<16x128xf32>
    tpu.vector_store %arg6[%c0_211, %c0_212], %236 {strides = array<i32>} : memref<16x128xf32, #tpu.memory_space<vmem>>, vector<16x128xf32>,
    %c12 = arith.constant 12 : index
    %c0_213 = arith.constant 0 : index
    %c0_214 = arith.constant 0 : index
    %238 = vector.load %arg1[%c12, %c0_213, %c0_214] : memref<16x16x128xbf16, #tpu.memory_space<vmem>>, vector<1x16x128xbf16>
    %239 = vector.shape_cast %238 : vector<1x16x128xbf16> to vector<16x128xbf16>
    %c0_215 = arith.constant 0 : index
    %c0_216 = arith.constant 0 : index
    %240 = vector.load %arg2[%c0_215, %c0_216] : memref<16x16xbf16, #tpu.memory_space<vmem>>, vector<16x16xbf16>
    %cst_217 = arith.constant dense<0.000000e+00> : vector<16x128xf32>
    %241 = tpu.matmul %240, %239, %cst_217 {dimension_numbers = #tpu.dot_dimension_numbers<[1], [0], [0], [1], [0, 0, 1, 1], [], []>} : vector<16x16xbf16>, vector<16x128xbf16>, vector<16x128xf32> -> vector<16x128xf32>
    %c0_218 = arith.constant 0 : index
    %c0_219 = arith.constant 0 : index
    %242 = vector.load %arg4[%c0_218, %c0_219] : memref<16x1xf32, #tpu.memory_space<vmem>>, vector<16x1xf32>
    %243 = vector.broadcast %242 : vector<16x1xf32> to vector<16x128xf32>
    %244 = arith.addf %241, %243 : vector<16x128xf32>
    %cst_220 = arith.constant 0.000000e+00 : f32
    %245 = vector.broadcast %cst_220 : f32 to vector<16x128xf32>
    %246 = arith.maximumf %244, %245 : vector<16x128xf32>
    %247 = arith.truncf %246 : vector<16x128xf32> to vector<16x128xbf16>
    %c0_221 = arith.constant 0 : index
    %c0_222 = arith.constant 0 : index
    %248 = vector.load %arg3[%c0_221, %c0_222] : memref<16x16xbf16, #tpu.memory_space<vmem>>, vector<16x16xbf16>
    %cst_223 = arith.constant dense<0.000000e+00> : vector<16x128xf32>
    %249 = tpu.matmul %248, %247, %cst_223 {dimension_numbers = #tpu.dot_dimension_numbers<[1], [0], [0], [1], [0, 0, 1, 1], [], []>} : vector<16x16xbf16>, vector<16x128xbf16>, vector<16x128xf32> -> vector<16x128xf32>
    %c0_224 = arith.constant 0 : index
    %c0_225 = arith.constant 0 : index
    %250 = vector.load %arg5[%c0_224, %c0_225] : memref<16x1xf32, #tpu.memory_space<vmem>>, vector<16x1xf32>
    %251 = vector.broadcast %250 : vector<16x1xf32> to vector<16x128xf32>
    %252 = arith.addf %249, %251 : vector<16x128xf32>
    %cst_226 = arith.constant 0.000000e+00 : f32
    %253 = vector.broadcast %cst_226 : f32 to vector<16x128xf32>
    %254 = arith.maximumf %252, %253 : vector<16x128xf32>
    %c0_227 = arith.constant 0 : index
    %c0_228 = arith.constant 0 : index
    %255 = vector.load %arg6[%c0_227, %c0_228] : memref<16x128xf32, #tpu.memory_space<vmem>>, vector<16x128xf32>
    %256 = arith.maximumf %255, %254 : vector<16x128xf32>
    %c0_229 = arith.constant 0 : index
    %c0_230 = arith.constant 0 : index
    %257 = vector.load %arg6[%c0_229, %c0_230] : memref<16x128xf32, #tpu.memory_space<vmem>>, vector<16x128xf32>
    tpu.vector_store %arg6[%c0_229, %c0_230], %256 {strides = array<i32>} : memref<16x128xf32, #tpu.memory_space<vmem>>, vector<16x128xf32>,
    %c13 = arith.constant 13 : index
    %c0_231 = arith.constant 0 : index
    %c0_232 = arith.constant 0 : index
    %258 = vector.load %arg1[%c13, %c0_231, %c0_232] : memref<16x16x128xbf16, #tpu.memory_space<vmem>>, vector<1x16x128xbf16>
    %259 = vector.shape_cast %258 : vector<1x16x128xbf16> to vector<16x128xbf16>
    %c0_233 = arith.constant 0 : index
    %c0_234 = arith.constant 0 : index
    %260 = vector.load %arg2[%c0_233, %c0_234] : memref<16x16xbf16, #tpu.memory_space<vmem>>, vector<16x16xbf16>
    %cst_235 = arith.constant dense<0.000000e+00> : vector<16x128xf32>
    %261 = tpu.matmul %260, %259, %cst_235 {dimension_numbers = #tpu.dot_dimension_numbers<[1], [0], [0], [1], [0, 0, 1, 1], [], []>} : vector<16x16xbf16>, vector<16x128xbf16>, vector<16x128xf32> -> vector<16x128xf32>
    %c0_236 = arith.constant 0 : index
    %c0_237 = arith.constant 0 : index
    %262 = vector.load %arg4[%c0_236, %c0_237] : memref<16x1xf32, #tpu.memory_space<vmem>>, vector<16x1xf32>
    %263 = vector.broadcast %262 : vector<16x1xf32> to vector<16x128xf32>
    %264 = arith.addf %261, %263 : vector<16x128xf32>
    %cst_238 = arith.constant 0.000000e+00 : f32
    %265 = vector.broadcast %cst_238 : f32 to vector<16x128xf32>
    %266 = arith.maximumf %264, %265 : vector<16x128xf32>
    %267 = arith.truncf %266 : vector<16x128xf32> to vector<16x128xbf16>
    %c0_239 = arith.constant 0 : index
    %c0_240 = arith.constant 0 : index
    %268 = vector.load %arg3[%c0_239, %c0_240] : memref<16x16xbf16, #tpu.memory_space<vmem>>, vector<16x16xbf16>
    %cst_241 = arith.constant dense<0.000000e+00> : vector<16x128xf32>
    %269 = tpu.matmul %268, %267, %cst_241 {dimension_numbers = #tpu.dot_dimension_numbers<[1], [0], [0], [1], [0, 0, 1, 1], [], []>} : vector<16x16xbf16>, vector<16x128xbf16>, vector<16x128xf32> -> vector<16x128xf32>
    %c0_242 = arith.constant 0 : index
    %c0_243 = arith.constant 0 : index
    %270 = vector.load %arg5[%c0_242, %c0_243] : memref<16x1xf32, #tpu.memory_space<vmem>>, vector<16x1xf32>
    %271 = vector.broadcast %270 : vector<16x1xf32> to vector<16x128xf32>
    %272 = arith.addf %269, %271 : vector<16x128xf32>
    %cst_244 = arith.constant 0.000000e+00 : f32
    %273 = vector.broadcast %cst_244 : f32 to vector<16x128xf32>
    %274 = arith.maximumf %272, %273 : vector<16x128xf32>
    %c0_245 = arith.constant 0 : index
    %c0_246 = arith.constant 0 : index
    %275 = vector.load %arg6[%c0_245, %c0_246] : memref<16x128xf32, #tpu.memory_space<vmem>>, vector<16x128xf32>
    %276 = arith.maximumf %275, %274 : vector<16x128xf32>
    %c0_247 = arith.constant 0 : index
    %c0_248 = arith.constant 0 : index
    %277 = vector.load %arg6[%c0_247, %c0_248] : memref<16x128xf32, #tpu.memory_space<vmem>>, vector<16x128xf32>
    tpu.vector_store %arg6[%c0_247, %c0_248], %276 {strides = array<i32>} : memref<16x128xf32, #tpu.memory_space<vmem>>, vector<16x128xf32>,
    %c14 = arith.constant 14 : index
    %c0_249 = arith.constant 0 : index
    %c0_250 = arith.constant 0 : index
    %278 = vector.load %arg1[%c14, %c0_249, %c0_250] : memref<16x16x128xbf16, #tpu.memory_space<vmem>>, vector<1x16x128xbf16>
    %279 = vector.shape_cast %278 : vector<1x16x128xbf16> to vector<16x128xbf16>
    %c0_251 = arith.constant 0 : index
    %c0_252 = arith.constant 0 : index
    %280 = vector.load %arg2[%c0_251, %c0_252] : memref<16x16xbf16, #tpu.memory_space<vmem>>, vector<16x16xbf16>
    %cst_253 = arith.constant dense<0.000000e+00> : vector<16x128xf32>
    %281 = tpu.matmul %280, %279, %cst_253 {dimension_numbers = #tpu.dot_dimension_numbers<[1], [0], [0], [1], [0, 0, 1, 1], [], []>} : vector<16x16xbf16>, vector<16x128xbf16>, vector<16x128xf32> -> vector<16x128xf32>
    %c0_254 = arith.constant 0 : index
    %c0_255 = arith.constant 0 : index
    %282 = vector.load %arg4[%c0_254, %c0_255] : memref<16x1xf32, #tpu.memory_space<vmem>>, vector<16x1xf32>
    %283 = vector.broadcast %282 : vector<16x1xf32> to vector<16x128xf32>
    %284 = arith.addf %281, %283 : vector<16x128xf32>
    %cst_256 = arith.constant 0.000000e+00 : f32
    %285 = vector.broadcast %cst_256 : f32 to vector<16x128xf32>
    %286 = arith.maximumf %284, %285 : vector<16x128xf32>
    %287 = arith.truncf %286 : vector<16x128xf32> to vector<16x128xbf16>
    %c0_257 = arith.constant 0 : index
    %c0_258 = arith.constant 0 : index
    %288 = vector.load %arg3[%c0_257, %c0_258] : memref<16x16xbf16, #tpu.memory_space<vmem>>, vector<16x16xbf16>
    %cst_259 = arith.constant dense<0.000000e+00> : vector<16x128xf32>
    %289 = tpu.matmul %288, %287, %cst_259 {dimension_numbers = #tpu.dot_dimension_numbers<[1], [0], [0], [1], [0, 0, 1, 1], [], []>} : vector<16x16xbf16>, vector<16x128xbf16>, vector<16x128xf32> -> vector<16x128xf32>
    %c0_260 = arith.constant 0 : index
    %c0_261 = arith.constant 0 : index
    %290 = vector.load %arg5[%c0_260, %c0_261] : memref<16x1xf32, #tpu.memory_space<vmem>>, vector<16x1xf32>
    %291 = vector.broadcast %290 : vector<16x1xf32> to vector<16x128xf32>
    %292 = arith.addf %289, %291 : vector<16x128xf32>
    %cst_262 = arith.constant 0.000000e+00 : f32
    %293 = vector.broadcast %cst_262 : f32 to vector<16x128xf32>
    %294 = arith.maximumf %292, %293 : vector<16x128xf32>
    %c0_263 = arith.constant 0 : index
    %c0_264 = arith.constant 0 : index
    %295 = vector.load %arg6[%c0_263, %c0_264] : memref<16x128xf32, #tpu.memory_space<vmem>>, vector<16x128xf32>
    %296 = arith.maximumf %295, %294 : vector<16x128xf32>
    %c0_265 = arith.constant 0 : index
    %c0_266 = arith.constant 0 : index
    %297 = vector.load %arg6[%c0_265, %c0_266] : memref<16x128xf32, #tpu.memory_space<vmem>>, vector<16x128xf32>
    tpu.vector_store %arg6[%c0_265, %c0_266], %296 {strides = array<i32>} : memref<16x128xf32, #tpu.memory_space<vmem>>, vector<16x128xf32>,
    %c15 = arith.constant 15 : index
    %c0_267 = arith.constant 0 : index
    %c0_268 = arith.constant 0 : index
    %298 = vector.load %arg1[%c15, %c0_267, %c0_268] : memref<16x16x128xbf16, #tpu.memory_space<vmem>>, vector<1x16x128xbf16>
    %299 = vector.shape_cast %298 : vector<1x16x128xbf16> to vector<16x128xbf16>
    %c0_269 = arith.constant 0 : index
    %c0_270 = arith.constant 0 : index
    %300 = vector.load %arg2[%c0_269, %c0_270] : memref<16x16xbf16, #tpu.memory_space<vmem>>, vector<16x16xbf16>
    %cst_271 = arith.constant dense<0.000000e+00> : vector<16x128xf32>
    %301 = tpu.matmul %300, %299, %cst_271 {dimension_numbers = #tpu.dot_dimension_numbers<[1], [0], [0], [1], [0, 0, 1, 1], [], []>} : vector<16x16xbf16>, vector<16x128xbf16>, vector<16x128xf32> -> vector<16x128xf32>
    %c0_272 = arith.constant 0 : index
    %c0_273 = arith.constant 0 : index
    %302 = vector.load %arg4[%c0_272, %c0_273] : memref<16x1xf32, #tpu.memory_space<vmem>>, vector<16x1xf32>
    %303 = vector.broadcast %302 : vector<16x1xf32> to vector<16x128xf32>
    %304 = arith.addf %301, %303 : vector<16x128xf32>
    %cst_274 = arith.constant 0.000000e+00 : f32
    %305 = vector.broadcast %cst_274 : f32 to vector<16x128xf32>
    %306 = arith.maximumf %304, %305 : vector<16x128xf32>
    %307 = arith.truncf %306 : vector<16x128xf32> to vector<16x128xbf16>
    %c0_275 = arith.constant 0 : index
    %c0_276 = arith.constant 0 : index
    %308 = vector.load %arg3[%c0_275, %c0_276] : memref<16x16xbf16, #tpu.memory_space<vmem>>, vector<16x16xbf16>
    %cst_277 = arith.constant dense<0.000000e+00> : vector<16x128xf32>
    %309 = tpu.matmul %308, %307, %cst_277 {dimension_numbers = #tpu.dot_dimension_numbers<[1], [0], [0], [1], [0, 0, 1, 1], [], []>} : vector<16x16xbf16>, vector<16x128xbf16>, vector<16x128xf32> -> vector<16x128xf32>
    %c0_278 = arith.constant 0 : index
    %c0_279 = arith.constant 0 : index
    %310 = vector.load %arg5[%c0_278, %c0_279] : memref<16x1xf32, #tpu.memory_space<vmem>>, vector<16x1xf32>
    %311 = vector.broadcast %310 : vector<16x1xf32> to vector<16x128xf32>
    %312 = arith.addf %309, %311 : vector<16x128xf32>
    %cst_280 = arith.constant 0.000000e+00 : f32
    %313 = vector.broadcast %cst_280 : f32 to vector<16x128xf32>
    %314 = arith.maximumf %312, %313 : vector<16x128xf32>
    %c0_281 = arith.constant 0 : index
    %c0_282 = arith.constant 0 : index
    %315 = vector.load %arg6[%c0_281, %c0_282] : memref<16x128xf32, #tpu.memory_space<vmem>>, vector<16x128xf32>
    %316 = arith.maximumf %315, %314 : vector<16x128xf32>
    %c0_283 = arith.constant 0 : index
    %c0_284 = arith.constant 0 : index
    %317 = vector.load %arg6[%c0_283, %c0_284] : memref<16x128xf32, #tpu.memory_space<vmem>>, vector<16x128xf32>
    tpu.vector_store %arg6[%c0_283, %c0_284], %316 {strides = array<i32>} : memref<16x128xf32, #tpu.memory_space<vmem>>, vector<16x128xf32>,
    return
  }
  func.func @transform_0(%arg0: i32) -> (i32, i32, i32) {
    %c0_i32 = arith.constant 0 : i32
    %c0_i32_0 = arith.constant 0 : i32
    %c0_i32_1 = arith.constant 0 : i32
    return %c0_i32, %c0_i32_0, %arg0 : i32, i32, i32
  }
  func.func @transform_1(%arg0: i32) -> (i32, i32) {
    %c0_i32 = arith.constant 0 : i32
    %c0_i32_0 = arith.constant 0 : i32
    %c0_i32_1 = arith.constant 0 : i32
    return %c0_i32, %c0_i32_0 : i32, i32
  }
  func.func @transform_2(%arg0: i32) -> (i32, i32) {
    %c0_i32 = arith.constant 0 : i32
    %c0_i32_0 = arith.constant 0 : i32
    %c0_i32_1 = arith.constant 0 : i32
    return %c0_i32, %c0_i32_0 : i32, i32
  }
  func.func @transform_3(%arg0: i32) -> (i32, i32) {
    %c0_i32 = arith.constant 0 : i32
    %c0_i32_0 = arith.constant 0 : i32
    %c0_i32_1 = arith.constant 0 : i32
    return %c0_i32, %c0_i32_0 : i32, i32
  }
  func.func @transform_4(%arg0: i32) -> (i32, i32) {
    %c0_i32 = arith.constant 0 : i32
    %c0_i32_0 = arith.constant 0 : i32
    %c0_i32_1 = arith.constant 0 : i32
    return %c0_i32, %c0_i32_0 : i32, i32
  }
  func.func @transform_5(%arg0: i32) -> (i32, i32) {
    %c0_i32 = arith.constant 0 : i32
    %c0_i32_0 = arith.constant 0 : i32
    return %c0_i32, %arg0 : i32, i32
  }
}

</mosaic_0001>

<bundles_post_ra>
// kernel: custom-call.12
= control target key start
LH: loop header
LB: loop body
LE: loop exit
PB: predicated region body
PF: predicated region fallthrough
CT: control target
= control target key end

     0   :  { %s6_s0 = inlined_call_operand.vmem [shape: f32[2,32], index: 0, kind: output, shape index: {}]  }

// kernel: set_abstraction_msg_forward.2
= control target key start
LH: loop header
LB: loop body
LE: loop exit
PB: predicated region body
PF: predicated region fallthrough
CT: control target
= control target key end

     0   :  { %v911_v0 = vmov 0   ;;  %vm48_vm0 = vcmask 130048   ;;  %s1048_s3 = inlined_call_operand.vmem [shape: f32[16,1], index: 3, kind: input, shape index: {}]   ;;  %s1049_s0 = inlined_call_operand.vmem [shape: bf16[8,16,128], index: 0, kind: input, shape index: {}]   ;;  %s1050_s1 = inlined_call_operand.vmem [shape: bf16[16,16], index: 1, kind: input, shape index: {}]   ;;  %s1051_s4 = inlined_call_operand.vmem [shape: f32[16,1], index: 4, kind: input, shape index: {}]   ;;  %s1052_s2 = inlined_call_operand.vmem [shape: bf16[16,16], index: 2, kind: input, shape index: {}]   ;;  %s1053_s5 = inlined_call_operand.vmem [shape: f32[16,128], index: 5, kind: output, shape index: {}]  }
   0x1   :  { %910 = vset.pattern.permute.xlu2 %v911_v0  ;;  %909 = vset.pattern.permute.xlu1 %v911_v0  ;;  %v206_v1 = vld [vmem:[%s1048_s3] sm:$0xff]  ;;  %v886_v3 = vld [vmem:[%s1049_s0 + $0x8] sm:$0xff]  ;;  %v889_v6 = vld [vmem:[%s1049_s0 + $0x10] sm:$0xff] }
   0x2   :  { %v883_v2 = vld [vmem:[%s1049_s0] sm:$0xff]  ;;  %908 = vset.pattern.permute.xlu0 %v911_v0  ;;  %210 = vperm.xlu2 %910, %v206_v1   ;;  %v892_v7 = vld [vmem:[%s1049_s0 + $0x18] sm:$0xff]  ;;  %v898_v9 = vld [vmem:[%s1049_s0 + $0x28] sm:$0xff] }
   0x3   :  { %v884_v4 = vld [vmem:[%s1050_s1] sm:$0xff]  ;;  %118 = vperm.xlu1 %909, %v206_v1   ;;  %29 = vperm.xlu0 %908, %v206_v1   ;;  %v207_v10 = vld [vmem:[%s1048_s3 + $0x8] sm:$0xff]  ;;  %v901_v13 = vld [vmem:[%s1049_s0 + $0x30] sm:$0xff] }
   0x4   :  { %v887_v5 = vld [vmem:[%s1050_s1] sm:$0xff]  ;;  %59 = vmatpush.bf16.msra.mxu0 %v883_v2  ;;  %147 = vmatpush.bf16.msra.mxu2 %v886_v3  ;;  %v904_v14 = vld [vmem:[%s1049_s0 + $0x38] sm:$0xff]  ;;  %v72_v17 = vld [vmem:[%s1051_s4 + $0x8] sm:$0xff] }
   0x5   :  { %v895_v8 = vld [vmem:[%s1049_s0 + $0x20] sm:$0xff] }
   0x6   :  { %v890_v11 = vld [vmem:[%s1050_s1] sm:$0xff] }
   0x7   :  { %765 = vmatmul.msk.bf16.vlgmr.msra.gmra.mxu0 %vm48_vm0, %v884_v4  ;;  %781 = vmatmul.msk.bf16.vlgmr.msra.gmra.mxu2 %vm48_vm0, %v887_v5  ;;  %v893_v12 = vld [vmem:[%s1050_s1] sm:$0xff] }
   0x8   :  { %239 = vmatpush.bf16.msrb.mxu0 %v889_v6  ;;  %331 = vmatpush.bf16.msrb.mxu2 %v892_v7  ;;  %v896_v15 = vld [vmem:[%s1050_s1] sm:$0xff] }
   0x9   :  { %v899_v16 = vld [vmem:[%s1050_s1] sm:$0xff] }
   0xa   :  { %215 = vperm.xlu2 %910, %v207_v10   ;;  %v71_v18 = vld [vmem:[%s1051_s4] sm:$0xff] }
   0xb   :  { %123 = vperm.xlu1 %909, %v207_v10   ;;  %34 = vperm.xlu0 %908, %v207_v10   ;;  %v902_v19 = vld [vmem:[%s1050_s1] sm:$0xff] }
   0xc   :  { %423 = vmatpush.bf16.msra.mxu0 %v895_v8  ;;  %515 = vmatpush.bf16.msra.mxu2 %v898_v9  ;;  %v905_v20 = vld [vmem:[%s1050_s1] sm:$0xff] }
   0xd   :  { %v885_v36 = vld [vmem:[%s1052_s2] sm:$0xff] }
   0xe   :  { %v888_v42 = vld [vmem:[%s1052_s2] sm:$0xff] }
   0xf   :  { %v891_v55 = vld [vmem:[%s1052_s2] sm:$0xff] }
  0x10   :  { %v894_v62 = vld [vmem:[%s1052_s2] sm:$0xff] }
  0x12   :  { %394 = vperm.xlu2 %910, %v206_v1  }
  0x13   :  { %307 = vperm.xlu1 %909, %v207_v10   ;;  %302 = vperm.xlu0 %908, %v206_v1  }
  0x17   :  { %797 = vmatmul.msk.bf16.vlgmr.msrb.gmra.mxu0 %vm48_vm0, %v890_v11  ;;  %813 = vmatmul.msk.bf16.vlgmr.msrb.gmra.mxu2 %vm48_vm0, %v893_v12  ;;  %v897_v11 = vld [vmem:[%s1052_s2] sm:$0xff] }
  0x18   :  { %607 = vmatpush.bf16.msrb.mxu0 %v901_v13  ;;  %699 = vmatpush.bf16.msrb.mxu2 %v904_v14 }
  0x1a   :  { %491 = vperm.xlu2 %910, %v207_v10  }
  0x1b   :  { %486 = vperm.xlu1 %909, %v206_v1   ;;  %399 = vperm.xlu0 %908, %v207_v10  }
  0x22   :  { %670 = vperm.xlu2 %910, %v206_v1  }
  0x23   :  { %583 = vperm.xlu1 %909, %v207_v10   ;;  %578 = vperm.xlu0 %908, %v206_v1  }
  0x27   :  { %829 = vmatmul.msk.bf16.vlgmr.msra.gmra.mxu0 %vm48_vm0, %v896_v15  ;;  %845 = vmatmul.msk.bf16.vlgmr.msra.gmra.mxu2 %vm48_vm0, %v899_v16 }
  0x2a   :  { %80 = vperm.xlu2 %910, %v72_v17  }
  0x2b   :  { %75 = vperm.xlu1 %909, %v71_v18   ;;  %675 = vperm.xlu0 %908, %v207_v10  }
  0x32   :  { %255 = vperm.xlu2 %910, %v71_v18  }
  0x33   :  { %168 = vperm.xlu1 %909, %v72_v17   ;;  %163 = vperm.xlu0 %908, %v71_v18  }
  0x37   :  { %861 = vmatmul.msk.bf16.vlgmr.msrb.gmra.mxu0 %vm48_vm0, %v902_v19  ;;  %877 = vmatmul.msk.bf16.vlgmr.msrb.gmra.mxu2 %vm48_vm0, %v905_v20 }
  0x3a   :  { %352 = vperm.xlu2 %910, %v72_v17  }
  0x3b   :  { %347 = vperm.xlu1 %909, %v71_v18   ;;  %260 = vperm.xlu0 %908, %v72_v17  }
  0x42   :  { %531 = vperm.xlu2 %910, %v71_v18  }
  0x43   :  { %444 = vperm.xlu1 %909, %v72_v17   ;;  %439 = vperm.xlu0 %908, %v71_v18  }
  0x4a   :  { %628 = vperm.xlu2 %910, %v72_v17  }
  0x4b   :  { %623 = vperm.xlu1 %909, %v71_v18   ;;  %536 = vperm.xlu0 %908, %v72_v17  }
  0x53   :  { %720 = vperm.xlu1 %909, %v72_v17   ;;  %715 = vperm.xlu0 %908, %v71_v18   ;;  %v900_v18 = vld [vmem:[%s1052_s2] sm:$0xff] }
  0x5c   :  { %v211_v31 = vpop.permute.xlu2 %210 }
  0x64   :  { %v216_v45 = vpop.permute.xlu2 %215 }
  0x6c   :  { %v395_v61 = vpop.permute.xlu2 %394 }
  0x74   :  { %v492_v9 = vpop.permute.xlu2 %491 }
  0x75   :  { %v30_v21 = vpop.permute.xlu0 %29  ;;  %v119_v23 = vpop.permute.xlu1 %118 }
  0x7d   :  { %v35_v26 = vpop.permute.xlu0 %34  ;;  %v124_v34 = vpop.permute.xlu1 %123 }
  0x84   :  { %v61_v22 = vpop.f32.mrf.mxu0 }
  0x85   :  { %v62_v24 = vadd.f32 %v61_v22, %v30_v21  ;;  %v303_v50 = vpop.permute.xlu0 %302  ;;  %v308_v53 = vpop.permute.xlu1 %307 }
  0x87   :  { %v66_v28 = vmax.f32 %v62_v24, 0.0 }
  0x8a   :  { %v149_v25 = vpop.f32.mrf.mxu2 }
  0x8b   :  { %v150_v32 = vadd.f32 %v149_v25, %v119_v23 }
  0x8c   :  { %v63_v27 = vpop.f32.mrf.mxu0 }
  0x8d   :  { %v64_v29 = vadd.f32 %v63_v27, %v35_v26  ;;  %v154_v39 = vmax.f32 %v150_v32, 0.0  ;;  %v400_v1 = vpop.permute.xlu0 %399  ;;  %v487_v6 = vpop.permute.xlu1 %486 }
  0x8e   :  { %v671_v26 = vpop.permute.xlu2 %670 }
  0x8f   :  { %v67_v30 = vmax.f32 %v64_v29, 0.0 }
  0x91   :  { %v68_v33 = vpack.c.bf16 %v67_v30, %v66_v28 }
  0x92   :  { %v151_v35 = vpop.f32.mrf.mxu2 }
  0x93   :  { %v152_v37 = vadd.f32 %v151_v35, %v124_v34  ;;  %98 = vmatpush.bf16.msra.mxu1 %v68_v33 }
  0x94   :  { %v241_v38 = vpop.f32.mrf.mxu0 }
  0x95   :  { %v155_v40 = vmax.f32 %v152_v37, 0.0  ;;  %v242_v44 = vadd.f32 %v241_v38, %v211_v31  ;;  %v579_v17 = vpop.permute.xlu0 %578  ;;  %v584_v21 = vpop.permute.xlu1 %583  ;;  %v903_v31 = vld [vmem:[%s1052_s2] sm:$0xff] }
  0x96   :  { %770 = vmatmul.msk.bf16.vlgmr.msra.gmra.mxu1 %vm48_vm0, %v885_v36  ;;  %v906_v36 = vld [vmem:[%s1052_s2] sm:$0xff] }
  0x97   :  { %v156_v41 = vpack.c.bf16 %v155_v40, %v154_v39  ;;  %v246_v48 = vmax.f32 %v242_v44, 0.0  ;;  %v81_v44 = vpop.permute.xlu2 %80 }
  0x99   :  { %186 = vmatpush.bf16.msra.mxu3 %v156_v41 }
  0x9a   :  { %v333_v43 = vpop.f32.mrf.mxu2 }
  0x9b   :  { %v334_v51 = vadd.f32 %v333_v43, %v303_v50 }
  0x9c   :  { %786 = vmatmul.msk.bf16.vlgmr.msra.gmra.mxu3 %vm48_vm0, %v888_v42  ;;  %v243_v46 = vpop.f32.mrf.mxu0 }
  0x9d   :  { %v244_v47 = vadd.f32 %v243_v46, %v216_v45  ;;  %v338_v58 = vmax.f32 %v334_v51, 0.0  ;;  %v676_v29 = vpop.permute.xlu0 %675  ;;  %v76_v40 = vpop.permute.xlu1 %75 }
  0x9f   :  { %v247_v49 = vmax.f32 %v244_v47, 0.0 }
  0xa1   :  { %v248_v52 = vpack.c.bf16 %v247_v49, %v246_v48  ;;  %v256_v49 = vpop.permute.xlu2 %255 }
  0xa2   :  { %v335_v54 = vpop.f32.mrf.mxu2 }
  0xa3   :  { %v336_v56 = vadd.f32 %v335_v54, %v308_v53  ;;  %278 = vmatpush.bf16.msrb.mxu1 %v248_v52 }
  0xa4   :  { %v425_v57 = vpop.f32.mrf.mxu0 }
  0xa5   :  { %v339_v59 = vmax.f32 %v336_v56, 0.0  ;;  %v426_v0 = vadd.f32 %v425_v57, %v395_v61  ;;  %v164_v42 = vpop.permute.xlu0 %163  ;;  %v169_v45 = vpop.permute.xlu1 %168 }
  0xa6   :  { %802 = vmatmul.msk.bf16.vlgmr.msrb.gmra.mxu1 %vm48_vm0, %v891_v55 }
  0xa7   :  { %v340_v60 = vpack.c.bf16 %v339_v59, %v338_v58  ;;  %v430_v4 = vmax.f32 %v426_v0, 0.0 }
  0xa9   :  { %370 = vmatpush.bf16.msrb.mxu3 %v340_v60  ;;  %v353_v55 = vpop.permute.xlu2 %352 }
  0xaa   :  { %v517_v63 = vpop.f32.mrf.mxu2 }
  0xab   :  { %v518_v7 = vadd.f32 %v517_v63, %v487_v6 }
  0xac   :  { %818 = vmatmul.msk.bf16.vlgmr.msrb.gmra.mxu3 %vm48_vm0, %v894_v62  ;;  %v427_v2 = vpop.f32.mrf.mxu0 }
  0xad   :  { %v428_v3 = vadd.f32 %v427_v2, %v400_v1  ;;  %v522_v14 = vmax.f32 %v518_v7, 0.0  ;;  %v261_v48 = vpop.permute.xlu0 %260  ;;  %v348_v51 = vpop.permute.xlu1 %347 }
  0xaf   :  { %v431_v5 = vmax.f32 %v428_v3, 0.0 }
  0xb1   :  { %v432_v8 = vpack.c.bf16 %v431_v5, %v430_v4  ;;  %v532_v4 = vpop.permute.xlu2 %531 }
  0xb2   :  { %v519_v10 = vpop.f32.mrf.mxu2 }
  0xb3   :  { %v520_v12 = vadd.f32 %v519_v10, %v492_v9  ;;  %462 = vmatpush.bf16.msra.mxu1 %v432_v8 }
  0xb4   :  { %v609_v13 = vpop.f32.mrf.mxu0 }
  0xb5   :  { %v523_v15 = vmax.f32 %v520_v12, 0.0  ;;  %v610_v20 = vadd.f32 %v609_v13, %v579_v17  ;;  %v440_v53 = vpop.permute.xlu0 %439  ;;  %v445_v56 = vpop.permute.xlu1 %444 }
  0xb6   :  { %834 = vmatmul.msk.bf16.vlgmr.msra.gmra.mxu1 %vm48_vm0, %v897_v11 }
  0xb7   :  { %v524_v16 = vpack.c.bf16 %v523_v15, %v522_v14  ;;  %v614_v24 = vmax.f32 %v610_v20, 0.0 }
  0xb9   :  { %554 = vmatpush.bf16.msra.mxu3 %v524_v16 }
  0xba   :  { %v701_v19 = vpop.f32.mrf.mxu2 }
  0xbb   :  { %v702_v27 = vadd.f32 %v701_v19, %v671_v26 }
  0xbc   :  { %850 = vmatmul.msk.bf16.vlgmr.msra.gmra.mxu3 %vm48_vm0, %v900_v18  ;;  %v611_v22 = vpop.f32.mrf.mxu0 }
  0xbd   :  { %v612_v23 = vadd.f32 %v611_v22, %v584_v21  ;;  %v706_v33 = vmax.f32 %v702_v27, 0.0  ;;  %v537_v61 = vpop.permute.xlu0 %536  ;;  %v624_v10 = vpop.permute.xlu1 %623 }
  0xbf   :  { %v615_v25 = vmax.f32 %v612_v23, 0.0 }
  0xc1   :  { %v616_v28 = vpack.c.bf16 %v615_v25, %v614_v24 }
  0xc2   :  { %v703_v30 = vpop.f32.mrf.mxu2 }
  0xc3   :  { %v704_v32 = vadd.f32 %v703_v30, %v676_v29  ;;  %646 = vmatpush.bf16.msrb.mxu1 %v616_v28 }
  0xc5   :  { %v707_v34 = vmax.f32 %v704_v32, 0.0  ;;  %v716_v22 = vpop.permute.xlu0 %715 }
  0xc6   :  { %866 = vmatmul.msk.bf16.vlgmr.msrb.gmra.mxu1 %vm48_vm0, %v903_v31 }
  0xc7   :  { %v708_v35 = vpack.c.bf16 %v707_v34, %v706_v33  ;;  %v629_v33 = vpop.permute.xlu2 %628 }
  0xc9   :  { %738 = vmatpush.bf16.msrb.mxu3 %v708_v35 }
  0xcc   :  { %882 = vmatmul.msk.bf16.vlgmr.msrb.gmra.mxu3 %vm48_vm0, %v906_v36 }
 0x113   :  { %v100_v37 = vpop.f32.mrf.mxu1 }
 0x114   :  { %v101_v59 = vadd.f32 %v100_v37, %v76_v40 }
 0x116   :  { %v105_v1 = vmax.f32 %v101_v59, 0.0 }
 0x11b   :  { %v102_v38 = vpop.f32.mrf.mxu1 }
 0x11c   :  { %v103_v11 = vadd.f32 %v102_v38, %v81_v44  ;;  %v721_v44 = vpop.permute.xlu1 %720 }
 0x11e   :  { %v106_v20 = vmax.f32 %v103_v11, 0.0 }
 0x11f   :  { %v188_v39 = vpop.f32.mrf.mxu3 }
 0x120   :  { %v189_v58 = vadd.f32 %v188_v39, %v164_v42 }
 0x122   :  { %v193_v62 = vmax.f32 %v189_v58, 0.0 }
 0x123   :  { %v280_v41 = vpop.f32.mrf.mxu1 }
 0x124   :  { %v281_v60 = vadd.f32 %v280_v41, %v256_v49  ;;  %v197_v7 = vmax.f32 %v105_v1, %v193_v62 }
 0x126   :  { %v285_v2 = vmax.f32 %v281_v60, 0.0 }
 0x127   :  { %v190_v43 = vpop.f32.mrf.mxu3 }
 0x128   :  { %v191_v5 = vadd.f32 %v190_v43, %v169_v45  ;;  %v289_v13 = vmax.f32 %v197_v7, %v285_v2 }
 0x12a   :  { %v194_v16 = vmax.f32 %v191_v5, 0.0 }
 0x12b   :  { %v282_v46 = vpop.f32.mrf.mxu1 }
 0x12c   :  { %v283_v12 = vadd.f32 %v282_v46, %v261_v48  ;;  %v198_v26 = vmax.f32 %v106_v20, %v194_v16 }
 0x12e   :  { %v286_v21 = vmax.f32 %v283_v12, 0.0 }
 0x12f   :  { %v372_v47 = vpop.f32.mrf.mxu3 }
 0x130   :  { %v373_v63 = vadd.f32 %v372_v47, %v348_v51  ;;  %v290_v34 = vmax.f32 %v198_v26, %v286_v21 }
 0x132   :  { %v377_v8 = vmax.f32 %v373_v63, 0.0 }
 0x133   :  { %v464_v50 = vpop.f32.mrf.mxu1 }
 0x134   :  { %v465_v3 = vadd.f32 %v464_v50, %v440_v53  ;;  %v381_v17 = vmax.f32 %v289_v13, %v377_v8 }
 0x136   :  { %v469_v14 = vmax.f32 %v465_v3, 0.0 }
 0x137   :  { %v374_v52 = vpop.f32.mrf.mxu3 }
 0x138   :  { %v375_v18 = vadd.f32 %v374_v52, %v353_v55  ;;  %v473_v23 = vmax.f32 %v381_v17, %v469_v14 }
 0x13a   :  { %v378_v29 = vmax.f32 %v375_v18, 0.0 }
 0x13b   :  { %v466_v54 = vpop.f32.mrf.mxu1 }
 0x13c   :  { %v467_v24 = vadd.f32 %v466_v54, %v445_v56  ;;  %v382_v39 = vmax.f32 %v290_v34, %v378_v29 }
 0x13e   :  { %v470_v35 = vmax.f32 %v467_v24, 0.0 }
 0x13f   :  { %v556_v57 = vpop.f32.mrf.mxu3 }
 0x140   :  { %v557_v9 = vadd.f32 %v556_v57, %v532_v4  ;;  %v474_v42 = vmax.f32 %v382_v39, %v470_v35 }
 0x142   :  { %v561_v19 = vmax.f32 %v557_v9, 0.0 }
 0x143   :  { %v648_v0 = vpop.f32.mrf.mxu1 }
 0x144   :  { %v649_v15 = vadd.f32 %v648_v0, %v624_v10  ;;  %v565_v30 = vmax.f32 %v473_v23, %v561_v19 }
 0x146   :  { %v653_v25 = vmax.f32 %v649_v15, 0.0 }
 0x147   :  { %v558_v6 = vpop.f32.mrf.mxu3 }
 0x148   :  { %v559_v31 = vadd.f32 %v558_v6, %v537_v61  ;;  %v657_v36 = vmax.f32 %v565_v30, %v653_v25 }
 0x14a   :  { %v562_v40 = vmax.f32 %v559_v31, 0.0 }
 0x14b   :  { %v650_v27 = vpop.f32.mrf.mxu1 }
 0x14c   :  { %v651_v37 = vadd.f32 %v650_v27, %v629_v33  ;;  %v566_v46 = vmax.f32 %v474_v42, %v562_v40 }
 0x14e   :  { %v654_v43 = vmax.f32 %v651_v37, 0.0 }
 0x14f   :  { %v740_v28 = vpop.f32.mrf.mxu3 }
 0x150   :  { %v741_v32 = vadd.f32 %v740_v28, %v716_v22  ;;  %v658_v48 = vmax.f32 %v566_v46, %v654_v43 }
 0x152   :  { %v745_v38 = vmax.f32 %v741_v32, 0.0 }
 0x154   :  { %v749_v41 = vmax.f32 %v657_v36, %v745_v38 }
 0x156   :  { %751 = vst [vmem:[%s1053_s5] sm:$0xff] %v749_v41 }
 0x157   :  { %v742_v45 = vpop.f32.mrf.mxu3 }
 0x158   :  { %v743_v47 = vadd.f32 %v742_v45, %v721_v44 }
 0x15a   :  { %v746_v49 = vmax.f32 %v743_v47, 0.0 }
 0x15c   :  { %v750_v50 = vmax.f32 %v658_v48, %v746_v49 }
 0x15e   :  { %752 = vst [vmem:[%s1053_s5 + $0x8] sm:$0xff] %v750_v50 }

// kernel: set_abstraction_msg_forward.3
= control target key start
LH: loop header
LB: loop body
LE: loop exit
PB: predicated region body
PF: predicated region fallthrough
CT: control target
= control target key end

     0   :  { %v1799_v0 = vmov 0   ;;  %vm48_vm0 = vcmask 130048   ;;  %s2117_s4 = inlined_call_operand.vmem [shape: f32[16,1], index: 4, kind: input, shape index: {}]   ;;  %s2118_s3 = inlined_call_operand.vmem [shape: f32[16,1], index: 3, kind: input, shape index: {}]   ;;  %s2119_s0 = inlined_call_operand.vmem [shape: bf16[16,16,128], index: 0, kind: input, shape index: {}]   ;;  %s2120_s1 = inlined_call_operand.vmem [shape: bf16[16,16], index: 1, kind: input, shape index: {}]   ;;  %s2121_s2 = inlined_call_operand.vmem [shape: bf16[16,16], index: 2, kind: input, shape index: {}]   ;;  %s2122_s5 = inlined_call_operand.vmem [shape: f32[16,128], index: 5, kind: output, shape index: {}]  }
   0x1   :  { %1798 = vset.pattern.permute.xlu2 %v1799_v0  ;;  %1797 = vset.pattern.permute.xlu1 %v1799_v0  ;;  %v1833_v1 = vld [vmem:[%s2117_s4] sm:$0xff]  ;;  %v1750_v4 = vld [vmem:[%s2119_s0 + $0x8] sm:$0xff]  ;;  %v1753_v7 = vld [vmem:[%s2119_s0 + $0x10] sm:$0xff] }
   0x2   :  { %v1838_v2 = vld [vmem:[%s2118_s3] sm:$0xff]  ;;  %1796 = vset.pattern.permute.xlu0 %v1799_v0  ;;  %75 = vperm.xlu1 %1797, %v1833_v1   ;;  %v1756_v8 = vld [vmem:[%s2119_s0 + $0x18] sm:$0xff]  ;;  %v1762_v10 = vld [vmem:[%s2119_s0 + $0x28] sm:$0xff] }
   0x3   :  { %v1747_v3 = vld [vmem:[%s2119_s0] sm:$0xff]  ;;  %118 = vperm.xlu2 %1798, %v1838_v2   ;;  %29 = vperm.xlu0 %1796, %v1838_v2   ;;  %v1872_v11 = vld [vmem:[%s2117_s4 + $0x8] sm:$0xff]  ;;  %v1765_v15 = vld [vmem:[%s2119_s0 + $0x30] sm:$0xff] }
   0x4   :  { %v1748_v5 = vld [vmem:[%s2120_s1] sm:$0xff]  ;;  %59 = vmatpush.bf16.msra.mxu0 %v1747_v3  ;;  %147 = vmatpush.bf16.msra.mxu2 %v1750_v4  ;;  %v1877_v12 = vld [vmem:[%s2118_s3 + $0x8] sm:$0xff]  ;;  %v1768_v16 = vld [vmem:[%s2119_s0 + $0x38] sm:$0xff] }
   0x5   :  { %v1751_v6 = vld [vmem:[%s2120_s1] sm:$0xff]  ;;  %v1774_v20 = vld [vmem:[%s2119_s0 + $0x48] sm:$0xff]  ;;  %v1777_v23 = vld [vmem:[%s2119_s0 + $0x50] sm:$0xff] }
   0x6   :  { %v1759_v9 = vld [vmem:[%s2119_s0 + $0x20] sm:$0xff]  ;;  %v1780_v24 = vld [vmem:[%s2119_s0 + $0x58] sm:$0xff]  ;;  %v1786_v28 = vld [vmem:[%s2119_s0 + $0x68] sm:$0xff] }
   0x7   :  { %1501 = vmatmul.msk.bf16.vlgmr.msra.gmra.mxu0 %vm48_vm0, %v1748_v5  ;;  %1517 = vmatmul.msk.bf16.vlgmr.msra.gmra.mxu2 %vm48_vm0, %v1751_v6  ;;  %v1754_v13 = vld [vmem:[%s2120_s1] sm:$0xff]  ;;  %v1789_v31 = vld [vmem:[%s2119_s0 + $0x70] sm:$0xff]  ;;  %v1792_v32 = vld [vmem:[%s2119_s0 + $0x78] sm:$0xff] }
   0x8   :  { %239 = vmatpush.bf16.msrb.mxu0 %v1753_v7  ;;  %331 = vmatpush.bf16.msrb.mxu2 %v1756_v8  ;;  %v1757_v14 = vld [vmem:[%s2120_s1] sm:$0xff] }
   0x9   :  { %v1760_v17 = vld [vmem:[%s2120_s1] sm:$0xff] }
   0xa   :  { %80 = vperm.xlu1 %1797, %v1872_v11   ;;  %v1763_v18 = vld [vmem:[%s2120_s1] sm:$0xff] }
   0xb   :  { %123 = vperm.xlu2 %1798, %v1877_v12   ;;  %34 = vperm.xlu0 %1796, %v1877_v12   ;;  %v1771_v19 = vld [vmem:[%s2119_s0 + $0x40] sm:$0xff] }
   0xc   :  { %423 = vmatpush.bf16.msra.mxu0 %v1759_v9  ;;  %515 = vmatpush.bf16.msra.mxu2 %v1762_v10  ;;  %v1766_v21 = vld [vmem:[%s2120_s1] sm:$0xff] }
   0xd   :  { %v1769_v22 = vld [vmem:[%s2120_s1] sm:$0xff] }
   0xe   :  { %v1772_v25 = vld [vmem:[%s2120_s1] sm:$0xff] }
   0xf   :  { %v1775_v26 = vld [vmem:[%s2120_s1] sm:$0xff] }
  0x10   :  { %v1783_v27 = vld [vmem:[%s2119_s0 + $0x60] sm:$0xff] }
  0x11   :  { %v1778_v29 = vld [vmem:[%s2120_s1] sm:$0xff] }
  0x12   :  { %168 = vperm.xlu1 %1797, %v1872_v11   ;;  %v1781_v30 = vld [vmem:[%s2120_s1] sm:$0xff] }
  0x13   :  { %210 = vperm.xlu2 %1798, %v1838_v2   ;;  %163 = vperm.xlu0 %1796, %v1833_v1   ;;  %v1784_v33 = vld [vmem:[%s2120_s1] sm:$0xff] }
  0x14   :  { %v1787_v34 = vld [vmem:[%s2120_s1] sm:$0xff] }
  0x15   :  { %v1790_v35 = vld [vmem:[%s2120_s1] sm:$0xff] }
  0x16   :  { %v1793_v36 = vld [vmem:[%s2120_s1] sm:$0xff] }
  0x17   :  { %1533 = vmatmul.msk.bf16.vlgmr.msrb.gmra.mxu0 %vm48_vm0, %v1754_v13  ;;  %1549 = vmatmul.msk.bf16.vlgmr.msrb.gmra.mxu2 %vm48_vm0, %v1757_v14  ;;  %v1749_v57 = vld [vmem:[%s2121_s2] sm:$0xff] }
  0x18   :  { %607 = vmatpush.bf16.msrb.mxu0 %v1765_v15  ;;  %699 = vmatpush.bf16.msrb.mxu2 %v1768_v16  ;;  %v1752_v0 = vld [vmem:[%s2121_s2] sm:$0xff] }
  0x19   :  { %v1755_v16 = vld [vmem:[%s2121_s2] sm:$0xff] }
  0x1a   :  { %255 = vperm.xlu1 %1797, %v1833_v1  }
  0x1b   :  { %260 = vperm.xlu2 %1798, %v1872_v11   ;;  %215 = vperm.xlu0 %1796, %v1877_v12  }
  0x22   :  { %307 = vperm.xlu1 %1797, %v1877_v12  }
  0x23   :  { %347 = vperm.xlu2 %1798, %v1833_v1   ;;  %302 = vperm.xlu0 %1796, %v1838_v2  }
  0x27   :  { %1565 = vmatmul.msk.bf16.vlgmr.msra.gmra.mxu0 %vm48_vm0, %v1760_v17  ;;  %1581 = vmatmul.msk.bf16.vlgmr.msra.gmra.mxu2 %vm48_vm0, %v1763_v18 }
  0x28   :  { %791 = vmatpush.bf16.msra.mxu0 %v1771_v19  ;;  %883 = vmatpush.bf16.msra.mxu2 %v1774_v20 }
  0x2a   :  { %399 = vperm.xlu1 %1797, %v1877_v12  }
  0x2b   :  { %486 = vperm.xlu2 %1798, %v1838_v2   ;;  %394 = vperm.xlu0 %1796, %v1838_v2  }
  0x32   :  { %578 = vperm.xlu1 %1797, %v1838_v2  }
  0x33   :  { %583 = vperm.xlu2 %1798, %v1877_v12   ;;  %491 = vperm.xlu0 %1796, %v1877_v12  }
  0x37   :  { %1597 = vmatmul.msk.bf16.vlgmr.msrb.gmra.mxu0 %vm48_vm0, %v1766_v21  ;;  %1613 = vmatmul.msk.bf16.vlgmr.msrb.gmra.mxu2 %vm48_vm0, %v1769_v22 }
  0x38   :  { %975 = vmatpush.bf16.msrb.mxu0 %v1777_v23  ;;  %1067 = vmatpush.bf16.msrb.mxu2 %v1780_v24  ;;  %v1758_v23 = vld [vmem:[%s2121_s2] sm:$0xff] }
  0x3a   :  { %675 = vperm.xlu1 %1797, %v1877_v12  }
  0x3b   :  { %762 = vperm.xlu2 %1798, %v1838_v2   ;;  %670 = vperm.xlu0 %1796, %v1838_v2  }
  0x42   :  { %854 = vperm.xlu1 %1797, %v1838_v2  }
  0x43   :  { %859 = vperm.xlu2 %1798, %v1877_v12   ;;  %767 = vperm.xlu0 %1796, %v1877_v12  }
  0x47   :  { %1629 = vmatmul.msk.bf16.vlgmr.msra.gmra.mxu0 %vm48_vm0, %v1772_v25  ;;  %1645 = vmatmul.msk.bf16.vlgmr.msra.gmra.mxu2 %vm48_vm0, %v1775_v26 }
  0x48   :  { %1159 = vmatpush.bf16.msra.mxu0 %v1783_v27  ;;  %1251 = vmatpush.bf16.msra.mxu2 %v1786_v28 }
  0x4a   :  { %951 = vperm.xlu1 %1797, %v1877_v12  }
  0x4b   :  { %1038 = vperm.xlu2 %1798, %v1838_v2   ;;  %946 = vperm.xlu0 %1796, %v1838_v2  }
  0x52   :  { %1130 = vperm.xlu1 %1797, %v1838_v2  }
  0x53   :  { %1135 = vperm.xlu2 %1798, %v1877_v12   ;;  %1043 = vperm.xlu0 %1796, %v1877_v12  }
  0x57   :  { %1661 = vmatmul.msk.bf16.vlgmr.msrb.gmra.mxu0 %vm48_vm0, %v1778_v29  ;;  %1677 = vmatmul.msk.bf16.vlgmr.msrb.gmra.mxu2 %vm48_vm0, %v1781_v30 }
  0x58   :  { %1343 = vmatpush.bf16.msrb.mxu0 %v1789_v31  ;;  %1435 = vmatpush.bf16.msrb.mxu2 %v1792_v32 }
  0x5a   :  { %1227 = vperm.xlu1 %1797, %v1877_v12  }
  0x5b   :  { %1314 = vperm.xlu2 %1798, %v1838_v2   ;;  %1222 = vperm.xlu0 %1796, %v1838_v2  }
  0x5d   :  { %v119_v39 = vpop.permute.xlu2 %118 }
  0x62   :  { %1406 = vperm.xlu1 %1797, %v1838_v2  }
  0x63   :  { %1411 = vperm.xlu2 %1798, %v1877_v12   ;;  %1319 = vperm.xlu0 %1796, %v1877_v12  }
  0x65   :  { %v124_v43 = vpop.permute.xlu2 %123 }
  0x67   :  { %1693 = vmatmul.msk.bf16.vlgmr.msra.gmra.mxu0 %vm48_vm0, %v1784_v33  ;;  %1709 = vmatmul.msk.bf16.vlgmr.msra.gmra.mxu2 %vm48_vm0, %v1787_v34 }
  0x6a   :  { %439 = vperm.xlu1 %1797, %v1833_v1  }
  0x6b   :  { %444 = vperm.xlu2 %1798, %v1872_v11   ;;  %352 = vperm.xlu0 %1796, %v1872_v11  }
  0x6d   :  { %v211_v54 = vpop.permute.xlu2 %210 }
  0x72   :  { %536 = vperm.xlu1 %1797, %v1872_v11  }
  0x73   :  { %623 = vperm.xlu2 %1798, %v1833_v1   ;;  %531 = vperm.xlu0 %1796, %v1833_v1  }
  0x74   :  { %v2007_v38 = vpop.permute.xlu1 %75 }
  0x75   :  { %v30_v37 = vpop.permute.xlu0 %29  ;;  %v2039_v4 = vpop.permute.xlu2 %260 }
  0x77   :  { %1725 = vmatmul.msk.bf16.vlgmr.msrb.gmra.mxu0 %vm48_vm0, %v1790_v35  ;;  %1741 = vmatmul.msk.bf16.vlgmr.msrb.gmra.mxu2 %vm48_vm0, %v1793_v36  ;;  %v1761_v36 = vld [vmem:[%s2121_s2] sm:$0xff] }
  0x7a   :  { %715 = vperm.xlu1 %1797, %v1833_v1  }
  0x7b   :  { %720 = vperm.xlu2 %1798, %v1872_v11   ;;  %628 = vperm.xlu0 %1796, %v1872_v11  }
  0x7c   :  { %v2015_v41 = vpop.permute.xlu1 %80 }
  0x7d   :  { %v35_v40 = vpop.permute.xlu0 %34  ;;  %v2048_v20 = vpop.permute.xlu2 %347 }
  0x82   :  { %812 = vperm.xlu1 %1797, %v1872_v11  }
  0x83   :  { %899 = vperm.xlu2 %1798, %v1833_v1   ;;  %807 = vperm.xlu0 %1796, %v1833_v1  }
  0x84   :  { %v61_v42 = vpop.f32.mrf.mxu0  ;;  %v2022_v49 = vpop.permute.xlu1 %168 }
  0x85   :  { %v2017_v44 = vpop.permute.xlu0 %163  ;;  %v62_v46 = vadd.f32 %v61_v42, %v30_v37  ;;  %v487_v30 = vpop.permute.xlu2 %486 }
  0x87   :  { %v66_v50 = vmax.f32 %v62_v46, 0.0 }
  0x8a   :  { %991 = vperm.xlu1 %1797, %v1833_v1   ;;  %v149_v45 = vpop.f32.mrf.mxu2 }
  0x8b   :  { %996 = vperm.xlu2 %1798, %v1872_v11   ;;  %904 = vperm.xlu0 %1796, %v1872_v11   ;;  %v150_v52 = vadd.f32 %v149_v45, %v119_v39 }
  0x8c   :  { %v63_v47 = vpop.f32.mrf.mxu0  ;;  %v2031_v63 = vpop.permute.xlu1 %255 }
  0x8d   :  { %v64_v48 = vadd.f32 %v63_v47, %v35_v40  ;;  %v216_v58 = vpop.permute.xlu0 %215  ;;  %v154_v60 = vmax.f32 %v150_v52, 0.0  ;;  %v584_v47 = vpop.permute.xlu2 %583 }
  0x8f   :  { %v67_v51 = vmax.f32 %v64_v48, 0.0 }
  0x91   :  { %v68_v53 = vpack.c.bf16 %v67_v51, %v66_v50 }
  0x92   :  { %1088 = vperm.xlu1 %1797, %v1872_v11   ;;  %v151_v55 = vpop.f32.mrf.mxu2 }
  0x93   :  { %1175 = vperm.xlu2 %1798, %v1833_v1   ;;  %1083 = vperm.xlu0 %1796, %v1833_v1   ;;  %v152_v56 = vadd.f32 %v151_v55, %v124_v43  ;;  %v1764_v43 = vld [vmem:[%s2121_s2] sm:$0xff] }
  0x94   :  { %98 = vmatpush.bf16.msra.mxu1 %v68_v53  ;;  %v241_v59 = vpop.f32.mrf.mxu0  ;;  %v308_v13 = vpop.permute.xlu1 %307 }
  0x95   :  { %v155_v61 = vmax.f32 %v152_v56, 0.0  ;;  %v242_v3 = vadd.f32 %v241_v59, %v211_v54  ;;  %v303_v7 = vpop.permute.xlu0 %302  ;;  %v1767_v59 = vld [vmem:[%s2121_s2] sm:$0xff] }
  0x97   :  { %1506 = vmatmul.msk.bf16.vlgmr.msra.gmra.mxu1 %vm48_vm0, %v1749_v57  ;;  %v156_v62 = vpack.c.bf16 %v155_v61, %v154_v60  ;;  %v246_v8 = vmax.f32 %v242_v3, 0.0  ;;  %v1770_v3 = vld [vmem:[%s2121_s2] sm:$0xff] }
  0x99   :  { %186 = vmatpush.bf16.msra.mxu3 %v156_v62 }
  0x9a   :  { %1267 = vperm.xlu1 %1797, %v1833_v1   ;;  %v333_v2 = vpop.f32.mrf.mxu2 }
  0x9b   :  { %1272 = vperm.xlu2 %1798, %v1872_v11   ;;  %1180 = vperm.xlu0 %1796, %v1872_v11   ;;  %v334_v10 = vadd.f32 %v333_v2, %v303_v7  ;;  %v763_v2 = vpop.permute.xlu2 %762 }
  0x9c   :  { %1522 = vmatmul.msk.bf16.vlgmr.msra.gmra.mxu3 %vm48_vm0, %v1752_v0  ;;  %v243_v5 = vpop.f32.mrf.mxu0  ;;  %v400_v25 = vpop.permute.xlu1 %399 }
  0x9d   :  { %v244_v6 = vadd.f32 %v243_v5, %v216_v58  ;;  %v338_v18 = vmax.f32 %v334_v10, 0.0  ;;  %v395_v22 = vpop.permute.xlu0 %394 }
  0x9f   :  { %v247_v9 = vmax.f32 %v244_v6, 0.0 }
  0xa1   :  { %v248_v12 = vpack.c.bf16 %v247_v9, %v246_v8 }
  0xa2   :  { %1364 = vperm.xlu1 %1797, %v1872_v11   ;;  %v335_v14 = vpop.f32.mrf.mxu2 }
  0xa3   :  { %1451 = vperm.xlu2 %1798, %v1833_v1   ;;  %1359 = vperm.xlu0 %1796, %v1833_v1   ;;  %v336_v15 = vadd.f32 %v335_v14, %v308_v13 }
  0xa4   :  { %278 = vmatpush.bf16.msrb.mxu1 %v248_v12  ;;  %v425_v17 = vpop.f32.mrf.mxu0  ;;  %v579_v42 = vpop.permute.xlu1 %578 }
  0xa5   :  { %v339_v19 = vmax.f32 %v336_v15, 0.0  ;;  %v426_v24 = vadd.f32 %v425_v17, %v395_v22  ;;  %v492_v33 = vpop.permute.xlu0 %491 }
  0xa7   :  { %1538 = vmatmul.msk.bf16.vlgmr.msrb.gmra.mxu1 %vm48_vm0, %v1755_v16  ;;  %v340_v21 = vpack.c.bf16 %v339_v19, %v338_v18  ;;  %v430_v28 = vmax.f32 %v426_v24, 0.0  ;;  %v860_v16 = vpop.permute.xlu2 %859  ;;  %v1773_v19 = vld [vmem:[%s2121_s2] sm:$0xff] }
  0xa9   :  { %370 = vmatpush.bf16.msrb.mxu3 %v340_v21 }
  0xaa   :  { %v517_v1 = vpop.f32.mrf.mxu2 }
  0xab   :  { %1456 = vperm.xlu0 %1796, %v1872_v11   ;;  %v518_v31 = vadd.f32 %v517_v1, %v487_v30 }
  0xac   :  { %1554 = vmatmul.msk.bf16.vlgmr.msrb.gmra.mxu3 %vm48_vm0, %v1758_v23  ;;  %v427_v26 = vpop.f32.mrf.mxu0  ;;  %v676_v56 = vpop.permute.xlu1 %675 }
  0xad   :  { %v428_v27 = vadd.f32 %v427_v26, %v400_v25  ;;  %v522_v11 = vmax.f32 %v518_v31, 0.0  ;;  %v671_v53 = vpop.permute.xlu0 %670  ;;  %v1776_v25 = vld [vmem:[%s2121_s2] sm:$0xff] }
  0xaf   :  { %v431_v29 = vmax.f32 %v428_v27, 0.0 }
  0xb1   :  { %v432_v32 = vpack.c.bf16 %v431_v29, %v430_v28 }
  0xb2   :  { %v519_v34 = vpop.f32.mrf.mxu2 }
  0xb3   :  { %v520_v35 = vadd.f32 %v519_v34, %v492_v33  ;;  %462 = vmatpush.bf16.msra.mxu1 %v432_v32  ;;  %v1039_v33 = vpop.permute.xlu2 %1038 }
  0xb4   :  { %v609_v37 = vpop.f32.mrf.mxu0  ;;  %v855_v13 = vpop.permute.xlu1 %854 }
  0xb5   :  { %v523_v39 = vmax.f32 %v520_v35, 0.0  ;;  %v610_v46 = vadd.f32 %v609_v37, %v579_v42  ;;  %v768_v7 = vpop.permute.xlu0 %767 }
  0xb7   :  { %v524_v40 = vpack.c.bf16 %v523_v39, %v522_v11  ;;  %1570 = vmatmul.msk.bf16.vlgmr.msra.gmra.mxu1 %vm48_vm0, %v1761_v36  ;;  %v614_v51 = vmax.f32 %v610_v46, 0.0  ;;  %v1779_v39 = vld [vmem:[%s2121_s2] sm:$0xff] }
  0xb9   :  { %554 = vmatpush.bf16.msra.mxu3 %v524_v40 }
  0xba   :  { %v701_v45 = vpop.f32.mrf.mxu2 }
  0xbb   :  { %v702_v54 = vadd.f32 %v701_v45, %v671_v53 }
  0xbc   :  { %1586 = vmatmul.msk.bf16.vlgmr.msra.gmra.mxu3 %vm48_vm0, %v1764_v43  ;;  %v611_v48 = vpop.f32.mrf.mxu0  ;;  %v952_v28 = vpop.permute.xlu1 %951 }
  0xbd   :  { %v612_v50 = vadd.f32 %v611_v48, %v584_v47  ;;  %v706_v61 = vmax.f32 %v702_v54, 0.0  ;;  %v947_v24 = vpop.permute.xlu0 %946  ;;  %v1782_v47 = vld [vmem:[%s2121_s2] sm:$0xff] }
  0xbf   :  { %v615_v52 = vmax.f32 %v612_v50, 0.0 }
  0xc1   :  { %v616_v55 = vpack.c.bf16 %v615_v52, %v614_v51  ;;  %v1136_v51 = vpop.permute.xlu2 %1135 }
  0xc2   :  { %v703_v57 = vpop.f32.mrf.mxu2 }
  0xc3   :  { %v704_v58 = vadd.f32 %v703_v57, %v676_v56  ;;  %646 = vmatpush.bf16.msrb.mxu1 %v616_v55 }
  0xc4   :  { %v793_v60 = vpop.f32.mrf.mxu0  ;;  %v1131_v46 = vpop.permute.xlu1 %1130 }
  0xc5   :  { %v707_v62 = vmax.f32 %v704_v58, 0.0  ;;  %v794_v6 = vadd.f32 %v793_v60, %v763_v2  ;;  %v1044_v36 = vpop.permute.xlu0 %1043 }
  0xc7   :  { %v708_v0 = vpack.c.bf16 %v707_v62, %v706_v61  ;;  %1602 = vmatmul.msk.bf16.vlgmr.msrb.gmra.mxu1 %vm48_vm0, %v1767_v59  ;;  %v798_v10 = vmax.f32 %v794_v6, 0.0  ;;  %v1785_v62 = vld [vmem:[%s2121_s2] sm:$0xff] }
  0xc9   :  { %738 = vmatpush.bf16.msrb.mxu3 %v708_v0  ;;  %v1315_v6 = vpop.permute.xlu2 %1314 }
  0xca   :  { %v885_v5 = vpop.f32.mrf.mxu2 }
  0xcb   :  { %v886_v14 = vadd.f32 %v885_v5, %v855_v13 }
  0xcc   :  { %1618 = vmatmul.msk.bf16.vlgmr.msrb.gmra.mxu3 %vm48_vm0, %v1770_v3  ;;  %v795_v8 = vpop.f32.mrf.mxu0  ;;  %v1228_v59 = vpop.permute.xlu1 %1227 }
  0xcd   :  { %v796_v9 = vadd.f32 %v795_v8, %v768_v7  ;;  %v890_v22 = vmax.f32 %v886_v14, 0.0  ;;  %v1223_v56 = vpop.permute.xlu0 %1222  ;;  %v1788_v7 = vld [vmem:[%s2121_s2] sm:$0xff] }
  0xcf   :  { %v799_v12 = vmax.f32 %v796_v9, 0.0 }
  0xd1   :  { %v800_v15 = vpack.c.bf16 %v799_v12, %v798_v10 }
  0xd2   :  { %v887_v17 = vpop.f32.mrf.mxu2 }
  0xd3   :  { %v888_v18 = vadd.f32 %v887_v17, %v860_v16  ;;  %830 = vmatpush.bf16.msra.mxu1 %v800_v15 }
  0xd4   :  { %v977_v21 = vpop.f32.mrf.mxu0  ;;  %v1407_v16 = vpop.permute.xlu1 %1406 }
  0xd5   :  { %v891_v23 = vmax.f32 %v888_v18, 0.0  ;;  %v978_v27 = vadd.f32 %v977_v21, %v947_v24  ;;  %v1320_v10 = vpop.permute.xlu0 %1319 }
  0xd7   :  { %v892_v1 = vpack.c.bf16 %v891_v23, %v890_v22  ;;  %1634 = vmatmul.msk.bf16.vlgmr.msra.gmra.mxu1 %vm48_vm0, %v1773_v19  ;;  %v982_v31 = vmax.f32 %v978_v27, 0.0  ;;  %v1412_v19 = vpop.permute.xlu2 %1411  ;;  %v1791_v23 = vld [vmem:[%s2121_s2] sm:$0xff] }
  0xd9   :  { %922 = vmatpush.bf16.msra.mxu3 %v892_v1 }
  0xda   :  { %v1069_v26 = vpop.f32.mrf.mxu2 }
  0xdb   :  { %v1070_v34 = vadd.f32 %v1069_v26, %v1039_v33  ;;  %v1794_v26 = vld [vmem:[%s2121_s2] sm:$0xff] }
  0xdc   :  { %1650 = vmatmul.msk.bf16.vlgmr.msra.gmra.mxu3 %vm48_vm0, %v1776_v25  ;;  %v979_v29 = vpop.f32.mrf.mxu0 }
  0xdd   :  { %v980_v30 = vadd.f32 %v979_v29, %v952_v28  ;;  %v1074_v42 = vmax.f32 %v1070_v34, 0.0 }
  0xdf   :  { %v983_v32 = vmax.f32 %v980_v30, 0.0 }
  0xe1   :  { %v984_v35 = vpack.c.bf16 %v983_v32, %v982_v31 }
  0xe2   :  { %v1071_v37 = vpop.f32.mrf.mxu2 }
  0xe3   :  { %v1072_v11 = vadd.f32 %v1071_v37, %v1044_v36  ;;  %1014 = vmatpush.bf16.msrb.mxu1 %v984_v35 }
  0xe4   :  { %v1161_v40 = vpop.f32.mrf.mxu0 }
  0xe5   :  { %v1075_v43 = vmax.f32 %v1072_v11, 0.0  ;;  %v1162_v50 = vadd.f32 %v1161_v40, %v1131_v46 }
  0xe7   :  { %v1076_v45 = vpack.c.bf16 %v1075_v43, %v1074_v42  ;;  %1666 = vmatmul.msk.bf16.vlgmr.msrb.gmra.mxu1 %vm48_vm0, %v1779_v39  ;;  %v1166_v54 = vmax.f32 %v1162_v50, 0.0 }
  0xe9   :  { %1106 = vmatpush.bf16.msrb.mxu3 %v1076_v45 }
  0xea   :  { %v1253_v48 = vpop.f32.mrf.mxu2 }
  0xeb   :  { %v1254_v57 = vadd.f32 %v1253_v48, %v1223_v56 }
  0xec   :  { %1682 = vmatmul.msk.bf16.vlgmr.msrb.gmra.mxu3 %vm48_vm0, %v1782_v47  ;;  %v1163_v52 = vpop.f32.mrf.mxu0 }
  0xed   :  { %v1164_v53 = vadd.f32 %v1163_v52, %v1136_v51  ;;  %v1258_v2 = vmax.f32 %v1254_v57, 0.0 }
  0xef   :  { %v1167_v55 = vmax.f32 %v1164_v53, 0.0 }
  0xf1   :  { %v1168_v58 = vpack.c.bf16 %v1167_v55, %v1166_v54 }
  0xf2   :  { %v1255_v60 = vpop.f32.mrf.mxu2 }
  0xf3   :  { %v1256_v61 = vadd.f32 %v1255_v60, %v1228_v59  ;;  %1198 = vmatpush.bf16.msra.mxu1 %v1168_v58 }
  0xf4   :  { %v1345_v0 = vpop.f32.mrf.mxu0 }
  0xf5   :  { %v1259_v3 = vmax.f32 %v1256_v61, 0.0  ;;  %v1346_v9 = vadd.f32 %v1345_v0, %v1315_v6  ;;  %v445_v61 = vpop.permute.xlu2 %444 }
  0xf7   :  { %v1260_v5 = vpack.c.bf16 %v1259_v3, %v1258_v2  ;;  %1698 = vmatmul.msk.bf16.vlgmr.msra.gmra.mxu1 %vm48_vm0, %v1785_v62  ;;  %v1350_v14 = vmax.f32 %v1346_v9, 0.0  ;;  %v440_v62 = vpop.permute.xlu1 %439 }
  0xf9   :  { %1290 = vmatpush.bf16.msra.mxu3 %v1260_v5 }
  0xfa   :  { %v1437_v8 = vpop.f32.mrf.mxu2 }
  0xfb   :  { %v1438_v17 = vadd.f32 %v1437_v8, %v1407_v16 }
  0xfc   :  { %1714 = vmatmul.msk.bf16.vlgmr.msra.gmra.mxu3 %vm48_vm0, %v1788_v7  ;;  %v1347_v12 = vpop.f32.mrf.mxu0 }
  0xfd   :  { %v1348_v13 = vadd.f32 %v1347_v12, %v1320_v10  ;;  %v1442_v1 = vmax.f32 %v1438_v17, 0.0  ;;  %v624_v3 = vpop.permute.xlu2 %623 }
  0xff   :  { %v1351_v15 = vmax.f32 %v1348_v13, 0.0  ;;  %v537_v5 = vpop.permute.xlu1 %536 }
 0x101   :  { %v1352_v18 = vpack.c.bf16 %v1351_v15, %v1350_v14 }
 0x102   :  { %v1439_v21 = vpop.f32.mrf.mxu2 }
 0x103   :  { %v1440_v22 = vadd.f32 %v1439_v21, %v1412_v19  ;;  %1382 = vmatpush.bf16.msrb.mxu1 %v1352_v18 }
 0x105   :  { %v1443_v24 = vmax.f32 %v1440_v22, 0.0  ;;  %v721_v8 = vpop.permute.xlu2 %720 }
 0x107   :  { %v1444_v25 = vpack.c.bf16 %v1443_v24, %v1442_v1  ;;  %1730 = vmatmul.msk.bf16.vlgmr.msrb.gmra.mxu1 %vm48_vm0, %v1791_v23  ;;  %v716_v10 = vpop.permute.xlu1 %715 }
 0x109   :  { %1474 = vmatpush.bf16.msrb.mxu3 %v1444_v25 }
 0x10c   :  { %1746 = vmatmul.msk.bf16.vlgmr.msrb.gmra.mxu3 %vm48_vm0, %v1794_v26 }
 0x10d   :  { %v900_v15 = vpop.permute.xlu2 %899 }
 0x10f   :  { %v813_v17 = vpop.permute.xlu1 %812 }
 0x114   :  { %v100_v27 = vpop.f32.mrf.mxu1 }
 0x115   :  { %v101_v29 = vadd.f32 %v100_v27, %v2007_v38  ;;  %v997_v22 = vpop.permute.xlu2 %996 }
 0x117   :  { %v105_v32 = vmax.f32 %v101_v29, 0.0  ;;  %v992_v23 = vpop.permute.xlu1 %991 }
 0x11c   :  { %v102_v28 = vpop.f32.mrf.mxu1 }
 0x11d   :  { %v103_v37 = vadd.f32 %v102_v28, %v2015_v41  ;;  %v353_v41 = vpop.permute.xlu0 %352  ;;  %v1176_v28 = vpop.permute.xlu2 %1175 }
 0x11f   :  { %v188_v30 = vpop.f32.mrf.mxu3  ;;  %v106_v43 = vmax.f32 %v103_v37, 0.0 }
 0x120   :  { %v189_v31 = vadd.f32 %v188_v30, %v2017_v44 }
 0x122   :  { %v193_v33 = vmax.f32 %v189_v31, 0.0 }
 0x124   :  { %v197_v34 = vmax.f32 %v105_v32, %v193_v33  ;;  %v280_v35 = vpop.f32.mrf.mxu1 }
 0x125   :  { %v281_v36 = vadd.f32 %v280_v35, %v2031_v63  ;;  %v532_v0 = vpop.permute.xlu0 %531 }
 0x127   :  { %v285_v11 = vmax.f32 %v281_v36, 0.0  ;;  %v190_v39 = vpop.f32.mrf.mxu3 }
 0x128   :  { %v191_v40 = vadd.f32 %v190_v39, %v2022_v49 }
 0x129   :  { %v289_v42 = vmax.f32 %v197_v34, %v285_v11  ;;  %v1089_v34 = vpop.permute.xlu1 %1088 }
 0x12a   :  { %v194_v45 = vmax.f32 %v191_v40, 0.0 }
 0x12c   :  { %v198_v46 = vmax.f32 %v106_v43, %v194_v45  ;;  %v282_v38 = vpop.f32.mrf.mxu1 }
 0x12d   :  { %v283_v47 = vadd.f32 %v282_v38, %v2039_v4  ;;  %v629_v6 = vpop.permute.xlu0 %628 }
 0x12f   :  { %v286_v44 = vmax.f32 %v283_v47, 0.0  ;;  %v372_v48 = vpop.f32.mrf.mxu3 }
 0x130   :  { %v373_v50 = vadd.f32 %v372_v48, %v2048_v20 }
 0x131   :  { %v290_v51 = vmax.f32 %v198_v46, %v286_v44 }
 0x132   :  { %v377_v52 = vmax.f32 %v373_v50, 0.0 }
 0x134   :  { %v381_v63 = vmax.f32 %v289_v42, %v377_v52  ;;  %v464_v53 = vpop.f32.mrf.mxu1 }
 0x135   :  { %v808_v13 = vpop.permute.xlu0 %807  ;;  %v465_v25 = vadd.f32 %v464_v53, %v440_v62  ;;  %v1273_v53 = vpop.permute.xlu2 %1272 }
 0x136   :  { %v1268_v62 = vpop.permute.xlu1 %1267 }
 0x137   :  { %v374_v54 = vpop.f32.mrf.mxu3  ;;  %v469_v29 = vmax.f32 %v465_v25, 0.0 }
 0x138   :  { %v375_v55 = vadd.f32 %v374_v54, %v353_v41 }
 0x139   :  { %v473_v36 = vmax.f32 %v381_v63, %v469_v29 }
 0x13a   :  { %v378_v56 = vmax.f32 %v375_v55, 0.0 }
 0x13c   :  { %v382_v49 = vmax.f32 %v290_v51, %v378_v56  ;;  %v466_v57 = vpop.f32.mrf.mxu1 }
 0x13d   :  { %v905_v18 = vpop.permute.xlu0 %904  ;;  %v467_v35 = vadd.f32 %v466_v57, %v445_v61  ;;  %v1452_v25 = vpop.permute.xlu2 %1451 }
 0x13f   :  { %v556_v58 = vpop.f32.mrf.mxu3  ;;  %v470_v38 = vmax.f32 %v467_v35, 0.0  ;;  %v1365_v35 = vpop.permute.xlu1 %1364 }
 0x140   :  { %v557_v27 = vadd.f32 %v556_v58, %v532_v0 }
 0x141   :  { %v474_v63 = vmax.f32 %v382_v49, %v470_v38 }
 0x142   :  { %v561_v31 = vmax.f32 %v557_v27, 0.0 }
 0x144   :  { %v648_v59 = vpop.f32.mrf.mxu1  ;;  %v565_v43 = vmax.f32 %v473_v36, %v561_v31 }
 0x145   :  { %v1084_v24 = vpop.permute.xlu0 %1083  ;;  %v649_v30 = vadd.f32 %v648_v59, %v624_v3 }
 0x147   :  { %v558_v60 = vpop.f32.mrf.mxu3  ;;  %v653_v37 = vmax.f32 %v649_v30, 0.0 }
 0x148   :  { %v559_v40 = vadd.f32 %v558_v60, %v537_v5 }
 0x149   :  { %v657_v44 = vmax.f32 %v565_v43, %v653_v37 }
 0x14a   :  { %v562_v51 = vmax.f32 %v559_v40, 0.0 }
 0x14c   :  { %v650_v4 = vpop.f32.mrf.mxu1  ;;  %v566_v0 = vmax.f32 %v474_v63, %v562_v51 }
 0x14d   :  { %v1181_v39 = vpop.permute.xlu0 %1180  ;;  %v651_v47 = vadd.f32 %v650_v4, %v629_v6 }
 0x14f   :  { %v740_v2 = vpop.f32.mrf.mxu3  ;;  %v654_v56 = vmax.f32 %v651_v47, 0.0 }
 0x150   :  { %v741_v32 = vadd.f32 %v740_v2, %v716_v10 }
 0x152   :  { %v745_v45 = vmax.f32 %v741_v32, 0.0 }
 0x154   :  { %v832_v20 = vpop.f32.mrf.mxu1  ;;  %v749_v41 = vmax.f32 %v657_v44, %v745_v45 }
 0x155   :  { %v833_v11 = vadd.f32 %v832_v20, %v808_v13 }
 0x157   :  { %v742_v7 = vpop.f32.mrf.mxu3  ;;  %v837_v48 = vmax.f32 %v833_v11, 0.0 }
 0x158   :  { %v743_v52 = vadd.f32 %v742_v7, %v721_v8  ;;  %v1360_v7 = vpop.permute.xlu0 %1359  ;;  %v658_v8 = vmax.f32 %v566_v0, %v654_v56 }
 0x159   :  { %v841_v59 = vmax.f32 %v749_v41, %v837_v48 }
 0x15a   :  { %v746_v2 = vmax.f32 %v743_v52, 0.0 }
 0x15c   :  { %v834_v9 = vpop.f32.mrf.mxu1 }
 0x15d   :  { %v835_v57 = vadd.f32 %v834_v9, %v813_v17  ;;  %v750_v9 = vmax.f32 %v658_v8, %v746_v2 }
 0x15f   :  { %v924_v12 = vpop.f32.mrf.mxu3  ;;  %v838_v10 = vmax.f32 %v835_v57, 0.0 }
 0x160   :  { %v925_v46 = vadd.f32 %v924_v12, %v900_v15 }
 0x162   :  { %v929_v54 = vmax.f32 %v925_v46, 0.0 }
 0x164   :  { %v1016_v14 = vpop.f32.mrf.mxu1  ;;  %v933_v20 = vmax.f32 %v841_v59, %v929_v54 }
 0x165   :  { %v1017_v50 = vadd.f32 %v1016_v14, %v992_v23 }
 0x167   :  { %v926_v16 = vpop.f32.mrf.mxu3  ;;  %v1021_v60 = vmax.f32 %v1017_v50, 0.0 }
 0x168   :  { %v927_v4 = vadd.f32 %v926_v16, %v905_v18 }
 0x169   :  { %v1025_v13 = vmax.f32 %v933_v20, %v1021_v60 }
 0x16a   :  { %v930_v15 = vmax.f32 %v927_v4, 0.0 }
 0x16c   :  { %v1018_v19 = vpop.f32.mrf.mxu1 }
 0x16d   :  { %v1019_v12 = vadd.f32 %v1018_v19, %v997_v22 }
 0x16f   :  { %v1108_v21 = vpop.f32.mrf.mxu3 }
 0x170   :  { %v1109_v55 = vadd.f32 %v1108_v21, %v1084_v24  ;;  %v1022_v24 = vmax.f32 %v1019_v12, 0.0 }
 0x172   :  { %v1113_v5 = vmax.f32 %v1109_v55, 0.0 }
 0x174   :  { %v1200_v1 = vpop.f32.mrf.mxu1  ;;  %v1117_v17 = vmax.f32 %v1025_v13, %v1113_v5 }
 0x175   :  { %v1201_v61 = vadd.f32 %v1200_v1, %v1176_v28  ;;  %v842_v1 = vmax.f32 %v750_v9, %v838_v10 }
 0x177   :  { %v1110_v26 = vpop.f32.mrf.mxu3  ;;  %v1205_v49 = vmax.f32 %v1201_v61, 0.0  ;;  %v934_v28 = vmax.f32 %v842_v1, %v930_v15 }
 0x178   :  { %v1111_v21 = vadd.f32 %v1110_v26, %v1089_v34 }
 0x179   :  { %v1209_v16 = vmax.f32 %v1117_v17, %v1205_v49  ;;  %v1026_v36 = vmax.f32 %v934_v28, %v1022_v24 }
 0x17a   :  { %v1114_v31 = vmax.f32 %v1111_v21, 0.0 }
 0x17c   :  { %v1202_v33 = vpop.f32.mrf.mxu1  ;;  %v1118_v34 = vmax.f32 %v1026_v36, %v1114_v31 }
 0x17d   :  { %v1203_v18 = vadd.f32 %v1202_v33, %v1181_v39  ;;  %v1457_v33 = vpop.permute.xlu0 %1456 }
 0x17f   :  { %v1292_v42 = vpop.f32.mrf.mxu3  ;;  %v1206_v37 = vmax.f32 %v1203_v18, 0.0 }
 0x180   :  { %v1293_v6 = vadd.f32 %v1292_v42, %v1268_v62 }
 0x181   :  { %v1210_v45 = vmax.f32 %v1118_v34, %v1206_v37 }
 0x182   :  { %v1297_v23 = vmax.f32 %v1293_v6, 0.0 }
 0x184   :  { %v1384_v58 = vpop.f32.mrf.mxu1  ;;  %v1301_v32 = vmax.f32 %v1209_v16, %v1297_v23 }
 0x185   :  { %v1385_v14 = vadd.f32 %v1384_v58, %v1360_v7 }
 0x187   :  { %v1294_v3 = vpop.f32.mrf.mxu3  ;;  %v1389_v27 = vmax.f32 %v1385_v14, 0.0 }
 0x188   :  { %v1295_v19 = vadd.f32 %v1294_v3, %v1273_v53 }
 0x189   :  { %v1393_v11 = vmax.f32 %v1301_v32, %v1389_v27 }
 0x18a   :  { %v1298_v42 = vmax.f32 %v1295_v19, 0.0 }
 0x18c   :  { %v1386_v29 = vpop.f32.mrf.mxu1  ;;  %v1302_v38 = vmax.f32 %v1210_v45, %v1298_v42 }
 0x18d   :  { %v1387_v40 = vadd.f32 %v1386_v29, %v1365_v35 }
 0x18f   :  { %v1476_v30 = vpop.f32.mrf.mxu3  ;;  %v1390_v46 = vmax.f32 %v1387_v40, 0.0 }
 0x190   :  { %v1477_v22 = vadd.f32 %v1476_v30, %v1452_v25 }
 0x191   :  { %v1394_v44 = vmax.f32 %v1302_v38, %v1390_v46 }
 0x192   :  { %v1481_v26 = vmax.f32 %v1477_v22, 0.0 }
 0x194   :  { %v1485_v43 = vmax.f32 %v1393_v11, %v1481_v26 }
 0x196   :  { %1487 = vst [vmem:[%s2122_s5] sm:$0xff] %v1485_v43 }
 0x197   :  { %v1478_v39 = vpop.f32.mrf.mxu3 }
 0x198   :  { %v1479_v47 = vadd.f32 %v1478_v39, %v1457_v33 }
 0x19a   :  { %v1482_v48 = vmax.f32 %v1479_v47, 0.0 }
 0x19c   :  { %v1486_v50 = vmax.f32 %v1394_v44, %v1482_v48 }
 0x19e   :  { %1488 = vst [vmem:[%s2122_s5 + $0x8] sm:$0xff] %v1486_v50 }

</bundles_post_ra>
